<compile_context>
chip_gen: v7x
topology: tpu7x:2x2x1
jax: 0.10.0
libtpu: 0.0.40
codegen_flags: <defaults>
</compile_context>

<pallas_src>
import functools

import jax
import jax.numpy as jnp
from jax import lax
from jax.experimental import pallas as pl
from jax.experimental.pallas import tpu as pltpu

_VMEM_LIMIT = 48 * 1024 * 1024          # v7x-safe (< 64 MiB physical), > default scoped limit
_TARGET_BLOCK_BYTES = 4 * 1024 * 1024   # target per-block VMEM for the streaming kernel


def _round_up(x, m):
    return ((x + m - 1) // m) * m


# ----------------------------------------------------------------------------
# Kernel 1: PPC + PPD over the contrast logits, tiled over rows (pure HBM stream).
#   inputs : logits [TN, P] f32, target [TN, 1] i32
#   output : per-tile partial sums [1, 8, 128]; lanes (0,0..2) = [ppc, ppd, count]
# ----------------------------------------------------------------------------
def _contrast_kernel(logits_ref, tgt_ref, out_ref):
    x = logits_ref[...]                                     # (TN, P) f32
    t = tgt_ref[...]                                        # (TN, 1) i32
    tn, p = x.shape

    valid = t != -1                                         # (TN, 1)
    tsafe = jnp.where(valid, t, 0)
    col = lax.broadcasted_iota(jnp.int32, (tn, p), 1)
    hit = col == tsafe                                      # (TN, P) bool

    m = jnp.max(x, axis=1, keepdims=True)
    lse = m + jnp.log(jnp.sum(jnp.exp(x - m), axis=1, keepdims=True))
    x_t = jnp.sum(jnp.where(hit, x, 0.0), axis=1, keepdims=True)  # raw logit at target

    ce = jnp.where(valid, lse - x_t, 0.0)                   # -log softmax(target)
    pd = jnp.where(valid, (1.0 - x_t) ** 2, 0.0)

    ppc_sum = jnp.sum(ce)
    ppd_sum = jnp.sum(pd)
    cnt = jnp.sum(valid.astype(jnp.float32))

    row = lax.broadcasted_iota(jnp.int32, (8, 128), 0)
    lane = lax.broadcasted_iota(jnp.int32, (8, 128), 1)
    out = jnp.where((row == 0) & (lane == 0), ppc_sum,
                    jnp.where((row == 0) & (lane == 1), ppd_sum,
                              jnp.where((row == 0) & (lane == 2), cnt, 0.0)))
    out_ref[0] = out.astype(jnp.float32)


def contrast_losses(logits, target, *, tile_n=4096):
    n, p = logits.shape
    x = logits.astype(jnp.float32)                          # no-op if already f32
    t = target.astype(jnp.int32)

    # Big blocks amortize the ~0.35us per grid-step overhead; cap so a
    # double-buffered block stays modest (v7x-safe VMEM budget).
    rows_cap = max(8, (_TARGET_BLOCK_BYTES // max(p * 4, 1)) // 8 * 8)
    tn = min(tile_n, rows_cap, _round_up(n, 8))
    # v7x has 2 TensorCores: guarantee >= 2 blocks along the parallel axis.
    if _round_up(n, tn) // tn < 2 and tn > 8:
        tn = max(8, _round_up(tn // 2, 8))
    n_pad = _round_up(n, tn)
    n_tiles = n_pad // tn

    if n_pad != n:                                          # single fused row pad (only if needed)
        x = jnp.pad(x, ((0, n_pad - n), (0, 0)))
        t = jnp.pad(t, (0, n_pad - n), constant_values=-1)
    t = t.reshape(n_pad, 1)

    out = pl.pallas_call(
        _contrast_kernel,
        out_shape=jax.ShapeDtypeStruct((n_tiles, 8, 128), jnp.float32),
        grid=(n_tiles,),
        in_specs=[
            pl.BlockSpec((tn, p), lambda i: (i, 0)),        # last dim == full P (legal)
            pl.BlockSpec((tn, 1), lambda i: (i, 0)),
        ],
        out_specs=pl.BlockSpec((1, 8, 128), lambda i: (i, 0, 0)),
        compiler_params=pltpu.CompilerParams(
            dimension_semantics=("parallel",),
            vmem_limit_bytes=_VMEM_LIMIT),
    )(x, t)

    totals = jnp.sum(out, axis=0)
    cnt = jnp.maximum(totals[0, 2], 1.0)
    return totals[0, 0] / cnt, totals[0, 1] / cnt


# ----------------------------------------------------------------------------
# Kernel 2: bilinear upsample (align_corners=True) of seg + pixel-wise CE.
# The width interpolation is precomputed in the wrapper (depends only on (b, j))
# and streamed as a (h, C*TW) bf16 slab with the class axis folded along lanes.
# Per grid step (b, j, i):
#   (1) ONE bf16 MXU matmul (TH, h) @ (h, C*TW) -> f32 VMEM scratch (all classes)
#   (2) pass 1: running class-max via aligned lane slices
#   (3) pass 2: streamed exp-sum + target-logit gather
# Output: per-tile partial sums [1,1,1,8,128]; lanes (0,0..1) = [ce_sum, count].
# ----------------------------------------------------------------------------
def _seg_ce_kernel(sw_ref, gt_ref, wh_ref, out_ref,
                   up_ref, m_ref, s_ref, xt_ref, *, num_classes, tile_w):
    # (1) height interpolation for ALL classes in a single bf16 matmul.
    up_ref[...] = jnp.dot(wh_ref[...], sw_ref[...],
                          preferred_element_type=jnp.float32)   # (TH, C*TW) f32

    t = gt_ref[0]                                               # (TH, TW) i32

    # (2) running max over classes (128-aligned static lane slices).
    for c in range(num_classes):
        u = up_ref[:, c * tile_w:(c + 1) * tile_w]
        if c == 0:
            m_ref[...] = u
        else:
            m_ref[...] = jnp.maximum(m_ref[...], u)

    # (3) streamed exp-sum + gather of the target-class logit.
    s_ref[...] = jnp.zeros_like(s_ref)
    xt_ref[...] = jnp.zeros_like(xt_ref)
    for c in range(num_classes):
        u = up_ref[:, c * tile_w:(c + 1) * tile_w]
        s_ref[...] += jnp.exp(u - m_ref[...])
        xt_ref[...] += jnp.where(t == c, u, 0.0)

    valid = t != -1
    lse = m_ref[...] + jnp.log(s_ref[...])
    ce = jnp.where(valid, lse - xt_ref[...], 0.0)
    ce_sum = jnp.sum(ce)
    cnt = jnp.sum(valid.astype(jnp.float32))

    row = lax.broadcasted_iota(jnp.int32, (8, 128), 0)
    lane = lax.broadcasted_iota(jnp.int32, (8, 128), 1)
    out_ref[0, 0, 0] = jnp.where((row == 0) & (lane == 0), ce_sum,
                                 jnp.where((row == 0) & (lane == 1), cnt, 0.0))


def seg_ce_loss(seg, gt, *, tile_h=128, tile_w=256):
    bsz, c, h, w = seg.shape
    big_h, big_w = gt.shape[1], gt.shape[2]

    # Height tile: multiple of 8 (or full); width tile: ALWAYS a multiple of 128 so
    # the per-class lane slices of the fused matmul result stay lane-tile aligned.
    if big_h <= tile_h:
        th = _round_up(big_h, 8)
        h_pad = th
    else:
        th = tile_h
        h_pad = _round_up(big_h, th)
    if big_w <= tile_w:
        tw = _round_up(big_w, 128)
        w_pad = tw
    else:
        tw = tile_w
        w_pad = _round_up(big_w, tw)
    n_th, n_tw = h_pad // th, w_pad // tw

    # v7x megacore: guarantee >= 2 blocks when the whole grid would be a single tile.
    if bsz * n_th * n_tw == 1 and th > 8:
        th = max(8, _round_up(th // 2, 8))
        h_pad = _round_up(big_h, th)
        n_th = h_pad // th

    # Interpolation matrices (align_corners=True); wh streamed to MXU in bf16.
    wh = jnp.pad(bilinear_matrix(big_h, h),
                 ((0, h_pad - big_h), (0, 0))).astype(jnp.bfloat16)       # (Hpad, h)
    ww = jnp.pad(bilinear_matrix(big_w, w), ((0, w_pad - big_w), (0, 0)))  # (Wpad, w)

    # Width interpolation hoisted out of the kernel (depends only on (b, c, j)).
    # Rearranged so the class axis is folded along lanes: (B, n_tw, h, C*TW) bf16.
    sw = jnp.einsum('bchw,Jw->bchJ', seg.astype(jnp.float32), ww,
                    preferred_element_type=jnp.float32)                    # (B, C, h, Wpad)
    sw = sw.reshape(bsz, c, h, n_tw, tw).transpose(0, 3, 2, 1, 4)
    sw = sw.reshape(bsz, n_tw, h, c * tw).astype(jnp.bfloat16)

    gt_p = gt.astype(jnp.int32)                              # no int8 cast (no C<=127 limit)
    if h_pad != big_h or w_pad != big_w:
        gt_p = jnp.pad(gt_p, ((0, 0), (0, h_pad - big_h), (0, w_pad - big_w)),
                       constant_values=-1)

    kernel = functools.partial(_seg_ce_kernel, num_classes=c, tile_w=tw)
    # Grid ordered (b, j, i): the sw block index only depends on (b, j), so it stays
    # resident in VMEM across all i steps (no redundant DMA / recompute per row tile).
    out = pl.pallas_call(
        kernel,
        out_shape=jax.ShapeDtypeStruct((bsz, n_th, n_tw, 8, 128), jnp.float32),
        grid=(bsz, n_tw, n_th),
        in_specs=[
            pl.BlockSpec((None, None, h, c * tw), lambda b, j, i: (b, j, 0, 0)),
            pl.BlockSpec((1, th, tw), lambda b, j, i: (b, i, j)),
            pl.BlockSpec((th, h), lambda b, j, i: (i, 0)),
        ],
        out_specs=pl.BlockSpec((1, 1, 1, 8, 128), lambda b, j, i: (b, i, j, 0, 0)),
        scratch_shapes=[
            pltpu.VMEM((th, c * tw), jnp.float32),           # upsampled logits, all classes
            pltpu.VMEM((th, tw), jnp.float32),               # running max
            pltpu.VMEM((th, tw), jnp.float32),               # running sum-exp
            pltpu.VMEM((th, tw), jnp.float32),               # gathered target logit
        ],
        compiler_params=pltpu.CompilerParams(
            dimension_semantics=("parallel", "parallel", "parallel"),
            vmem_limit_bytes=_VMEM_LIMIT),
    )(sw, gt_p, wh)

    totals = jnp.sum(out, axis=(0, 1, 2))
    cnt = jnp.maximum(totals[0, 1], 1.0)
    return totals[0, 0] / cnt


# ----------------------------------------------------------------------------
# Glue: bilinear interpolation matrices (align_corners=True) + loss combine.
# ----------------------------------------------------------------------------
def bilinear_matrix(out_size, in_size):
    if in_size == 1:
        return jnp.ones((out_size, 1), jnp.float32)
    src = jnp.arange(out_size, dtype=jnp.float32) * (in_size - 1) / (out_size - 1)
    lo = jnp.clip(jnp.floor(src).astype(jnp.int32), 0, in_size - 2)
    frac = src - lo.astype(jnp.float32)
    rows = jnp.arange(out_size)
    mat = jnp.zeros((out_size, in_size), jnp.float32)
    mat = mat.at[rows, lo].add(1.0 - frac)
    mat = mat.at[rows, lo + 1].add(frac)
    return mat


def plhn_loss(contrast_logits, contrast_target, seg, gt):
    """Returns 10 * (0.01*PPC + 0.001*PPD + CE(bilinear_upsample(seg), gt))."""
    ppc, ppd = contrast_losses(contrast_logits, contrast_target)
    ce = seg_ce_loss(seg, gt)
    loss_con = 0.01 * ppc + 0.001 * ppd + ce
    return 10.0 * loss_con


# Pure-JAX reference (mirrors the kernel pipeline: f32 contrast logits, bf16 MXU
# operands for the two interpolation matmuls with f32 accumulation).
def plhn_loss_ref(contrast_logits, contrast_target, seg, gt):
    logits = contrast_logits.astype(jnp.float32)
    valid = contrast_target != -1
    lse = jax.nn.logsumexp(logits, axis=1)
    x_t = jnp.take_along_axis(
        logits, jnp.maximum(contrast_target, 0)[:, None], axis=1)[:, 0]
    nvalid = jnp.maximum(jnp.sum(valid.astype(jnp.float32)), 1.0)
    ppc = jnp.sum(jnp.where(valid, lse - x_t, 0.0)) / nvalid
    ppd = jnp.sum(jnp.where(valid, (1.0 - x_t) ** 2, 0.0)) / nvalid

    big_h, big_w = gt.shape[1], gt.shape[2]
    wh = bilinear_matrix(big_h, seg.shape[2]).astype(jnp.bfloat16)
    ww = bilinear_matrix(big_w, seg.shape[3])
    sw = jnp.einsum('bchw,Jw->bchJ', seg.astype(jnp.float32), ww,
                    preferred_element_type=jnp.float32).astype(jnp.bfloat16)
    up = jnp.einsum('Hh,bchJ->bcHJ', wh, sw, preferred_element_type=jnp.float32)

    lse2 = jax.nn.logsumexp(up, axis=1)
    x_t2 = jnp.take_along_axis(up, jnp.maximum(gt, 0)[:, None], axis=1)[:, 0]
    v2 = gt != -1
    ce = (jnp.sum(jnp.where(v2, lse2 - x_t2, 0.0)) /
          jnp.maximum(jnp.sum(v2.astype(jnp.float32)), 1.0))
    return 10.0 * (0.01 * ppc + 0.001 * ppd + ce)


if __name__ == "__main__":
    key = jax.random.PRNGKey(0)
    k1, k2, k3, k4, k5, k6 = jax.random.split(key, 6)

    B, C = 2, 4                 # batch, segmentation classes
    h, w = 8, 8                 # seg spatial (pre-upsample)
    H, W = 16, 16               # gt spatial
    P = 16                      # prototype-logit width (classes * prototypes)
    N = B * H * W               # flattened pixels for the contrast loss

    contrast_logits = jax.random.normal(k1, (N, P), jnp.float32)
    contrast_target = jax.random.randint(k2, (N,), 0, P, jnp.int32)
    ignore_mask = jax.random.uniform(k3, (N,)) < 0.1
    contrast_target = jnp.where(ignore_mask, -1, contrast_target)

    seg = jax.random.normal(k4, (B, C, h, w), jnp.float32)
    gt = jax.random.randint(k5, (B, H, W), 0, C, jnp.int32)
    gt_ignore = jax.random.uniform(k6, (B, H, W)) < 0.1
    gt = jnp.where(gt_ignore, -1, gt)

    out = plhn_loss(contrast_logits, contrast_target, seg, gt)
    out = jax.block_until_ready(out)

    ref = plhn_loss_ref(contrast_logits, contrast_target, seg, gt)
    assert jnp.allclose(out, ref, rtol=1e-3, atol=1e-3), (out, ref)

    print("KERNEL_OK")
</pallas_src>

<mosaic_0001>
module attributes {stable_mosaic.version = 11 : i64} {
  func.func @_contrast_kernel(%arg0: i32, %arg1: memref<256x16xf32, #tpu.memory_space<vmem>>, %arg2: memref<256x1xi32, #tpu.memory_space<vmem>>, %arg3: memref<1x8x128xf32, #tpu.memory_space<vmem>>) attributes {dimension_semantics = [#tpu.dimension_semantics<parallel>], iteration_bounds = array<i64: 2>, scalar_prefetch = 0 : i64, scratch_operands = 0 : i64, tpu.core_type = #tpu.core_type<tc>, window_params = [{transform_indices = @transform_0, window_bounds = array<i64: 256, 16>}, {transform_indices = @transform_1, window_bounds = array<i64: 256, 1>}, {transform_indices = @transform_2, window_bounds = array<i64: 1, 8, 128>}]} {
    %c0 = arith.constant 0 : index
    %c0_0 = arith.constant 0 : index
    %0 = vector.load %arg1[%c0, %c0_0] : memref<256x16xf32, #tpu.memory_space<vmem>>, vector<256x16xf32>
    %c0_1 = arith.constant 0 : index
    %c0_2 = arith.constant 0 : index
    %1 = vector.load %arg2[%c0_1, %c0_2] : memref<256x1xi32, #tpu.memory_space<vmem>>, vector<256x1xi32>
    %c-1_i32 = arith.constant -1 : i32
    %2 = vector.broadcast %c-1_i32 : i32 to vector<256x1xi32>
    %3 = arith.cmpi ne, %1, %2 : vector<256x1xi32>
    %c0_i32 = arith.constant 0 : i32
    %4 = vector.broadcast %c0_i32 : i32 to vector<256x1xi32>
    %5 = arith.select %3, %1, %4 : vector<256x1xi1>, vector<256x1xi32>
    %6 = tpu.iota {dimensions = array<i32: 1>} : vector<256x16xi32>
    %7 = vector.broadcast %5 : vector<256x1xi32> to vector<256x16xi32>
    %8 = arith.cmpi eq, %6, %7 : vector<256x16xi32>
    %cst = arith.constant dense<0xFF800000> : vector<256xf32>
    %9 = vector.multi_reduction <maximumf>, %0, %cst [1] : vector<256x16xf32> to vector<256xf32>
    %10 = vector.shape_cast %9 : vector<256xf32> to vector<256x1xf32>
    %11 = vector.broadcast %10 : vector<256x1xf32> to vector<256x16xf32>
    %12 = arith.subf %0, %11 : vector<256x16xf32>
    %13 = math.exp %12 : vector<256x16xf32>
    %cst_3 = arith.constant dense<0.000000e+00> : vector<256xf32>
    %14 = vector.multi_reduction <add>, %13, %cst_3 [1] : vector<256x16xf32> to vector<256xf32>
    %15 = vector.shape_cast %14 : vector<256xf32> to vector<256x1xf32>
    %16 = math.log %15 : vector<256x1xf32>
    %17 = arith.addf %10, %16 : vector<256x1xf32>
    %cst_4 = arith.constant 0.000000e+00 : f32
    %18 = vector.broadcast %cst_4 : f32 to vector<256x16xf32>
    %19 = arith.select %8, %0, %18 : vector<256x16xi1>, vector<256x16xf32>
    %cst_5 = arith.constant dense<0.000000e+00> : vector<256xf32>
    %20 = vector.multi_reduction <add>, %19, %cst_5 [1] : vector<256x16xf32> to vector<256xf32>
    %21 = vector.shape_cast %20 : vector<256xf32> to vector<256x1xf32>
    %22 = arith.subf %17, %21 : vector<256x1xf32>
    %cst_6 = arith.constant 0.000000e+00 : f32
    %23 = vector.broadcast %cst_6 : f32 to vector<256x1xf32>
    %24 = arith.select %3, %22, %23 : vector<256x1xi1>, vector<256x1xf32>
    %cst_7 = arith.constant 1.000000e+00 : f32
    %25 = vector.broadcast %cst_7 : f32 to vector<256x1xf32>
    %26 = arith.subf %25, %21 : vector<256x1xf32>
    %27 = arith.mulf %26, %26 : vector<256x1xf32>
    %cst_8 = arith.constant 0.000000e+00 : f32
    %28 = vector.broadcast %cst_8 : f32 to vector<256x1xf32>
    %29 = arith.select %3, %27, %28 : vector<256x1xi1>, vector<256x1xf32>
    %30 = vector.shape_cast %24 : vector<256x1xf32> to vector<1x256x1xf32>
    %cst_9 = arith.constant dense<0.000000e+00> : vector<1xf32>
    %31 = vector.multi_reduction <add>, %30, %cst_9 [1, 2] : vector<1x256x1xf32> to vector<1xf32>
    %32 = vector.shape_cast %31 : vector<1xf32> to vector<1x1x1xf32>
    %33 = vector.extract %32[0, 0, 0] : f32 from vector<1x1x1xf32>
    %34 = vector.shape_cast %29 : vector<256x1xf32> to vector<1x256x1xf32>
    %cst_10 = arith.constant dense<0.000000e+00> : vector<1xf32>
    %35 = vector.multi_reduction <add>, %34, %cst_10 [1, 2] : vector<1x256x1xf32> to vector<1xf32>
    %36 = vector.shape_cast %35 : vector<1xf32> to vector<1x1x1xf32>
    %37 = vector.extract %36[0, 0, 0] : f32 from vector<1x1x1xf32>
    %38 = arith.extui %3 : vector<256x1xi1> to vector<256x1xi32>
    %39 = arith.sitofp %38 : vector<256x1xi32> to vector<256x1xf32>
    %40 = vector.shape_cast %39 : vector<256x1xf32> to vector<1x256x1xf32>
    %cst_11 = arith.constant dense<0.000000e+00> : vector<1xf32>
    %41 = vector.multi_reduction <add>, %40, %cst_11 [1, 2] : vector<1x256x1xf32> to vector<1xf32>
    %42 = vector.shape_cast %41 : vector<1xf32> to vector<1x1x1xf32>
    %43 = vector.extract %42[0, 0, 0] : f32 from vector<1x1x1xf32>
    %44 = tpu.iota {dimensions = array<i32: 0>} : vector<8x128xi32>
    %45 = tpu.iota {dimensions = array<i32: 1>} : vector<8x128xi32>
    %c0_i32_12 = arith.constant 0 : i32
    %46 = vector.broadcast %c0_i32_12 : i32 to vector<8x128xi32>
    %47 = arith.cmpi eq, %44, %46 : vector<8x128xi32>
    %c0_i32_13 = arith.constant 0 : i32
    %48 = vector.broadcast %c0_i32_13 : i32 to vector<8x128xi32>
    %49 = arith.cmpi eq, %45, %48 : vector<8x128xi32>
    %50 = arith.andi %47, %49 : vector<8x128xi1>
    %c0_i32_14 = arith.constant 0 : i32
    %51 = vector.broadcast %c0_i32_14 : i32 to vector<8x128xi32>
    %52 = arith.cmpi eq, %44, %51 : vector<8x128xi32>
    %c1_i32 = arith.constant 1 : i32
    %53 = vector.broadcast %c1_i32 : i32 to vector<8x128xi32>
    %54 = arith.cmpi eq, %45, %53 : vector<8x128xi32>
    %55 = arith.andi %52, %54 : vector<8x128xi1>
    %c0_i32_15 = arith.constant 0 : i32
    %56 = vector.broadcast %c0_i32_15 : i32 to vector<8x128xi32>
    %57 = arith.cmpi eq, %44, %56 : vector<8x128xi32>
    %c2_i32 = arith.constant 2 : i32
    %58 = vector.broadcast %c2_i32 : i32 to vector<8x128xi32>
    %59 = arith.cmpi eq, %45, %58 : vector<8x128xi32>
    %60 = arith.andi %57, %59 : vector<8x128xi1>
    %cst_16 = arith.constant 0.000000e+00 : f32
    %61 = vector.broadcast %43 : f32 to vector<8x128xf32>
    %62 = vector.broadcast %cst_16 : f32 to vector<8x128xf32>
    %63 = arith.select %60, %61, %62 : vector<8x128xi1>, vector<8x128xf32>
    %64 = vector.broadcast %37 : f32 to vector<8x128xf32>
    %65 = arith.select %55, %64, %63 : vector<8x128xi1>, vector<8x128xf32>
    %66 = vector.broadcast %33 : f32 to vector<8x128xf32>
    %67 = arith.select %50, %66, %65 : vector<8x128xi1>, vector<8x128xf32>
    %c0_17 = arith.constant 0 : index
    %c0_18 = arith.constant 0 : index
    %c0_19 = arith.constant 0 : index
    %68 = vector.load %arg3[%c0_17, %c0_18, %c0_19] : memref<1x8x128xf32, #tpu.memory_space<vmem>>, vector<1x8x128xf32>
    %69 = vector.shape_cast %68 : vector<1x8x128xf32> to vector<8x128xf32>
    %70 = vector.shape_cast %67 : vector<8x128xf32> to vector<1x8x128xf32>
    tpu.vector_store %arg3[%c0_17, %c0_18, %c0_19], %70 {strides = array<i32>} : memref<1x8x128xf32, #tpu.memory_space<vmem>>, vector<1x8x128xf32>,
    return
  }
  func.func @transform_0(%arg0: i32) -> (i32, i32) {
    %c0_i32 = arith.constant 0 : i32
    %c0_i32_0 = arith.constant 0 : i32
    return %arg0, %c0_i32 : i32, i32
  }
  func.func @transform_1(%arg0: i32) -> (i32, i32) {
    %c0_i32 = arith.constant 0 : i32
    %c0_i32_0 = arith.constant 0 : i32
    return %arg0, %c0_i32 : i32, i32
  }
  func.func @transform_2(%arg0: i32) -> (i32, i32, i32) {
    %c0_i32 = arith.constant 0 : i32
    %c0_i32_0 = arith.constant 0 : i32
    %c0_i32_1 = arith.constant 0 : i32
    return %arg0, %c0_i32, %c0_i32_0 : i32, i32, i32
  }
}

</mosaic_0001>

<bundles_post_ra>
// kernel: tpu_custom_call.1
= control target key start
LH: loop header
LB: loop body
LE: loop exit
PB: predicated region body
PF: predicated region fallthrough
CT: control target
= control target key end

     0   :  { %7 = vsyncpa [#allocation3], 0  ;;  %s3035_s0 = inlined_call_operand.vmem [shape: f32[512,16], index: 0, kind: input, shape index: {}]   ;;  %s3036_s1 = inlined_call_operand.vmem [shape: s32[512,1], index: 1, kind: input, shape index: {}]   ;;  %s3037_s2 = inlined_call_operand.hbm [shape: f32[2,8,128], index: 2, kind: output, shape index: {}]  }
   0x1   :  { %9 = vsyncpa [#allocation3 + $0x1], 0  ;;  %s1794_s9 = smov 0   ;;  %s1796_s10 = smov 0  }
   0x2   :  { %s1798_s11 = smov 0   ;;  %s1800_s12 = smov 0  }
   0x3 LB: > { %s1815_s13 = sadd.s32 4294967295, %s1774_s12   ;;  %s1479_s14 = sadd.s32 4294967294, %s1774_s12   ;;  %s1774_s12 = sphi %s1800_s12, %s3357_s12   ;;  %s1770_s11 = sphi %s1798_s11, %s3356_s11   ;;  %s1766_s10 = sphi %s1796_s10, %s3355_s10   ;;  %s1762_s9 = sphi %s1794_s9, %s3354_s9  }
   0x4   : > { %s1819_s15 = sadd.s32 1, %s1774_s12   ;;  %s74_s16 = sadd.s32 1, %s1770_s11 }
   0x5   : > { %s71_s17 = ssub.s32 %s1774_s12, %s1819_s15  ;;  %p84_p0 = scmp.ne.s32.totalorder %s1770_s11, %s1766_s10 }
   0x6   : > { %p72_p1 = scmp.eq.s32.totalorder %s71_s17, 0  ;;  %p85_p2 = scmp.eq.s32.totalorder %s1815_s13, 1 }
   0x7   : > { %p90_p3 = scmp.ne.s32.totalorder %s1766_s10, %s1762_s9  ;;  %p91_p4 = scmp.eq.s32.totalorder %s1479_s14, 1 }
   0x8   : > { %s1830_s18 = scalar_select %p72_p1, %s1770_s11, %s74_s16  }
   0x9   : > { %p1832_p5 = por %p85_p2, %p84_p0  ;;  %p1836_p6 = por %p91_p4, %p90_p3 }
   0xa   : > { %p1482_p7 = scmp.ge.s32.totalorder %s1774_s12, 1  ;;  %p127_p8 = scmp.lt.s32.totalorder %s1774_s12, 3 }
   0xc   : > { %p128_p9 = pnand %p1482_p7, %p127_p8 }
   0xe   : > { %131 = sbr.rel (%p128_p9) target bundleno = 828 (0x33c), region = 28 }
  0x15   : > { %s1484_s21 = sshll.u32 %s1815_s13, 5  ;;  %vm424_vm0 = vcmask 130048   ;;  %v1776_v46 = vmov 0   ;;  %s151_s29 = sand.u32 1, %s1766_s10  }
  0x16   : > { %p155_p10 = scmp.lt.s32.totalorder %s1484_s21, 63  ;;  %1571 = vset.pattern.permute.xlu0 %v1776_v46  ;;  %1572 = vset.pattern.permute.xlu1 %v1776_v46  ;;  %s1483_s30 = sshll.u32 %s151_s29, 3 }
  0x17   : > { %s1521_s5 = sshll.u32 %s1815_s13, 7  ;;  %s153_s7 = scalar_lea.vmem [#allocation2], %s1483_s30 }
  0x18   : > { %s3359_s21 = smov (!%p155_p10, %s1484_s21), 63  ;;  %s1408_s8 = sshll.u32 %s153_s7, 4  ;;  %s2995_s8 = int_to_ptr.vmem [resolvable:$true] %s1408_s8 }
  0x19   : > { %s1485_s22 = sshll.u32 %s3359_s21, 3  ;;  %s2993_s17 = scalar_lea.hbm %s3037_s2, %s1521_s5 }
  0x1a   : > { %s1851_s25 = scalar_lea.vmem %s3035_s0, %s1485_s22  ;;  %s2033_s28 = scalar_lea.vmem %s3036_s1, %s1485_s22 }
  0x1b   : > { %v1854_v0 = vld [vmem:[%s1851_s25] sm:$0xff]  ;;  %v1857_v1 = vld [vmem:[%s1851_s25 + $0x8] sm:$0xff]  ;;  %v1860_v2 = vld [vmem:[%s1851_s25 + $0x10] sm:$0xff]  ;;  %s1395_s13 = scalar_lea.sflag [#allocation3], %s151_s29  ;;  %s1712_s21 = scalar_lea.vmem %s2995_s8, 128 }
  0x1c   : > { %v425_v3 = vsel %vm424_vm0, %v1854_v0, -inf  ;;  %v431_v4 = vsel %vm424_vm0, %v1860_v2, -inf  ;;  %v1867_v5 = vld [vmem:[%s1851_s25 + $0x18] sm:$0xff]  ;;  %v428_v6 = vsel %vm424_vm0, %v1857_v1, -inf  ;;  %v1874_v8 = vld [vmem:[%s1851_s25 + $0x28] sm:$0xff]  ;;  %v1877_v9 = vld [vmem:[%s1851_s25 + $0x20] sm:$0xff]  ;;  %p1713_p11 = scmp.ne.s32.totalorder %s2995_s8, %s1712_s21 }
  0x1d   : > { %426 = vmax.xlane.f32.xlu0 %v425_v3  ;;  %432 = vmax.xlane.f32.xlu1 %v431_v4  ;;  %v434_v7 = vsel %vm424_vm0, %v1867_v5, -inf  ;;  %v440_v10 = vsel %vm424_vm0, %v1874_v8, -inf  ;;  %v437_v11 = vsel %vm424_vm0, %v1877_v9, -inf  ;;  %v1884_v12 = vld [vmem:[%s1851_s25 + $0x30] sm:$0xff]  ;;  %v1887_v13 = vld [vmem:[%s1851_s25 + $0x38] sm:$0xff]  ;;  %v1894_v16 = vld [vmem:[%s1851_s25 + $0x40] sm:$0xff] }
  0x1e   : > { %v443_v14 = vsel %vm424_vm0, %v1884_v12, -inf  ;;  %v446_v15 = vsel %vm424_vm0, %v1887_v13, -inf  ;;  %v1897_v17 = vld [vmem:[%s1851_s25 + $0x48] sm:$0xff]  ;;  %v449_v18 = vsel %vm424_vm0, %v1894_v16, -inf  ;;  %v1904_v20 = vld [vmem:[%s1851_s25 + $0x50] sm:$0xff]  ;;  %v1907_v21 = vld [vmem:[%s1851_s25 + $0x58] sm:$0xff]  ;;  %p1714_p12 = pnand %p1713_p11, %p1832_p5 }
  0x1f   : > { %v452_v19 = vsel %vm424_vm0, %v1897_v17, -inf  ;;  %v455_v22 = vsel %vm424_vm0, %v1904_v20, -inf  ;;  %v458_v23 = vsel %vm424_vm0, %v1907_v21, -inf  ;;  %v1914_v24 = vld [vmem:[%s1851_s25 + $0x60] sm:$0xff]  ;;  %v1917_v25 = vld [vmem:[%s1851_s25 + $0x68] sm:$0xff]  ;;  %v1924_v28 = vld [vmem:[%s1851_s25 + $0x70] sm:$0xff] }
  0x20   : > { %v461_v26 = vsel %vm424_vm0, %v1914_v24, -inf  ;;  %v464_v27 = vsel %vm424_vm0, %v1917_v25, -inf  ;;  %v1927_v29 = vld [vmem:[%s1851_s25 + $0x78] sm:$0xff]  ;;  %v467_v30 = vsel %vm424_vm0, %v1924_v28, -inf  ;;  %v1934_v32 = vld [vmem:[%s1851_s25 + $0x80] sm:$0xff]  ;;  %v1937_v33 = vld [vmem:[%s1851_s25 + $0x88] sm:$0xff]  ;;  %p1715_p13 = pneg %p1714_p12 }
  0x21   : > { %429 = vmax.xlane.f32.xlu0 %v428_v6  ;;  %435 = vmax.xlane.f32.xlu1 %v434_v7  ;;  %v470_v31 = vsel %vm424_vm0, %v1927_v29, -inf  ;;  %v473_v34 = vsel %vm424_vm0, %v1934_v32, -inf  ;;  %v476_v35 = vsel %vm424_vm0, %v1937_v33, -inf  ;;  %v1944_v36 = vld [vmem:[%s1851_s25 + $0x98] sm:$0xff]  ;;  %v1947_v37 = vld [vmem:[%s1851_s25 + $0x90] sm:$0xff]  ;;  %v1954_v40 = vld [vmem:[%s1851_s25 + $0xa8] sm:$0xff] }
  0x22   : > { %v482_v38 = vsel %vm424_vm0, %v1944_v36, -inf  ;;  %v479_v39 = vsel %vm424_vm0, %v1947_v37, -inf  ;;  %v1957_v41 = vld [vmem:[%s1851_s25 + $0xa0] sm:$0xff]  ;;  %v488_v42 = vsel %vm424_vm0, %v1954_v40, -inf  ;;  %v1964_v44 = vld [vmem:[%s1851_s25 + $0xb8] sm:$0xff]  ;;  %v1967_v45 = vld [vmem:[%s1851_s25 + $0xb0] sm:$0xff] }
  0x23   : > { %v485_v43 = vsel %vm424_vm0, %v1957_v41, -inf  ;;  %v494_v47 = vsel %vm424_vm0, %v1964_v44, -inf  ;;  %v491_v48 = vsel %vm424_vm0, %v1967_v45, -inf  ;;  %v1974_v49 = vld [vmem:[%s1851_s25 + $0xc8] sm:$0xff]  ;;  %v1977_v50 = vld [vmem:[%s1851_s25 + $0xc0] sm:$0xff]  ;;  %v1984_v53 = vld [vmem:[%s1851_s25 + $0xd8] sm:$0xff] }
  0x24   : > { %v500_v51 = vsel %vm424_vm0, %v1974_v49, -inf  ;;  %v497_v52 = vsel %vm424_vm0, %v1977_v50, -inf  ;;  %v1987_v54 = vld [vmem:[%s1851_s25 + $0xd0] sm:$0xff]  ;;  %v506_v55 = vsel %vm424_vm0, %v1984_v53, -inf  ;;  %v1994_v57 = vld [vmem:[%s1851_s25 + $0xe8] sm:$0xff]  ;;  %v1997_v58 = vld [vmem:[%s1851_s25 + $0xe0] sm:$0xff] }
  0x25   : > { %441 = vmax.xlane.f32.xlu1 %v440_v10  ;;  %438 = vmax.xlane.f32.xlu0 %v437_v11  ;;  %v503_v56 = vsel %vm424_vm0, %v1987_v54, -inf  ;;  %3154 = vst [vmem:[#allocation5_spill] sm:$0xff] %v1994_v57  ;;  %v512_v59 = vsel %vm424_vm0, %v1994_v57, -inf  ;;  %v509_v60 = vsel %vm424_vm0, %v1997_v58, -inf  ;;  %v2004_v61 = vld [vmem:[%s1851_s25 + $0xf8] sm:$0xff]  ;;  %v2007_v62 = vld [vmem:[%s1851_s25 + $0xf0] sm:$0xff] }
  0x26   : > { %3155 = vst [vmem:[#allocation6_spill] sm:$0xff] %v2004_v61  ;;  %3156 = vst [vmem:[#allocation7_spill] sm:$0xff] %v2007_v62  ;;  %v518_v63 = vsel %vm424_vm0, %v2004_v61, -inf  ;;  %v515_v3 = vsel %vm424_vm0, %v2007_v62, -inf  ;;  %s1778_s22 = smov [#allocation2]  }
  0x27   : > { %s1716_s23 = sshll.u32 %s1778_s22, 4  ;;  %s1717_s23 = int_to_ptr.vmem [resolvable:$false] %s1716_s23 }
  0x28   : > { %s1718_s24 = scalar_lea.vmem %s1717_s23, 256  ;;  %p1719_p0 = scmp.lt.s32.totalorder %s2995_s8, %s1717_s23 }
  0x29   : > { %444 = vmax.xlane.f32.xlu0 %v443_v14  ;;  %447 = vmax.xlane.f32.xlu1 %v446_v15  ;;  %p1720_p1 = scmp.lt.s32.totalorder %s1718_s24, %s1712_s21 }
  0x2b   : > { %p1721_p2 = por %p1720_p1, %p1719_p0 }
  0x2d   : > { %450 = vmax.xlane.f32.xlu0 %v449_v18  ;;  %453 = vmax.xlane.f32.xlu1 %v452_v19  ;;  %p1722_p3 = pnand %p1721_p2, %p1715_p13 }
  0x31   : > { %456 = vmax.xlane.f32.xlu0 %v455_v22  ;;  %459 = vmax.xlane.f32.xlu1 %v458_v23 }
  0x35   : > { %462 = vmax.xlane.f32.xlu0 %v461_v26  ;;  %465 = vmax.xlane.f32.xlu1 %v464_v27 }
  0x39   : > { %468 = vmax.xlane.f32.xlu0 %v467_v30  ;;  %471 = vmax.xlane.f32.xlu1 %v470_v31 }
  0x3d   : > { %474 = vmax.xlane.f32.xlu0 %v473_v34  ;;  %477 = vmax.xlane.f32.xlu1 %v476_v35  ;;  %v2036_v34 = vld [vmem:[%s2033_s28] sm:$0xff]  ;;  %v2040_v35 = vld [vmem:[%s2033_s28 + $0x8] sm:$0xff] }
  0x3e   : > { %vm230_vm1 = vcmp.ne.s32.totalorder %v2036_v34, 4294967295  ;;  %vm231_vm2 = vcmp.ne.s32.totalorder %v2040_v35, 4294967295 }
  0x3f   : > { %v263_v46 = vsel %vm231_vm2, %v2040_v35, 0 }
  0x41   : > { %483 = vmax.xlane.f32.xlu0 %v482_v38  ;;  %480 = vmax.xlane.f32.xlu1 %v479_v39  ;;  %v2043_v38 = vld [vmem:[%s2033_s28 + $0x10] sm:$0xff]  ;;  %v262_v39 = vsel %vm230_vm1, %v2036_v34, 0 }
  0x42   : > { %vm232_vm3 = vcmp.ne.s32.totalorder %v2043_v38, 4294967295 }
  0x45   : > { %489 = vmax.xlane.f32.xlu0 %v488_v42  ;;  %486 = vmax.xlane.f32.xlu1 %v485_v43  ;;  %v2051_v42 = vld [vmem:[%s2033_s28 + $0x18] sm:$0xff]  ;;  %v2054_v43 = vld [vmem:[%s2033_s28 + $0x20] sm:$0xff] }
  0x46   : > { %3160 = vst [vmem:[#allocation11_spill] sm:$0xff] %v2051_v42  ;;  %3161 = vst [vmem:[#allocation12_spill] sm:$0xff] %v2054_v43  ;;  %vm233_vm4 = vcmp.ne.s32.totalorder %v2051_v42, 4294967295  ;;  %vm234_vm5 = vcmp.ne.s32.totalorder %v2054_v43, 4294967295 }
  0x49   : > { %495 = vmax.xlane.f32.xlu0 %v494_v47  ;;  %492 = vmax.xlane.f32.xlu1 %v491_v48  ;;  %v264_v47 = vsel %vm232_vm3, %v2043_v38, 0  ;;  %v2065_v48 = vld [vmem:[%s2033_s28 + $0x28] sm:$0xff] }
  0x4a   : > { %3162 = vst [vmem:[#allocation13_spill] sm:$0xff] %v2065_v48  ;;  %vm235_vm6 = vcmp.ne.s32.totalorder %v2065_v48, 4294967295 }
  0x4d   : > { %501 = vmax.xlane.f32.xlu0 %v500_v51  ;;  %498 = vmax.xlane.f32.xlu1 %v497_v52  ;;  %v2068_v51 = vld [vmem:[%s2033_s28 + $0x30] sm:$0xff]  ;;  %v265_v52 = vsel %vm233_vm4, %v2051_v42, 0 }
  0x4e   : > { %3163 = vst [vmem:[#allocation14_spill] sm:$0xff] %v2068_v51  ;;  %vm236_vm7 = vcmp.ne.s32.totalorder %v2068_v51, 4294967295 }
  0x51   : > { %507 = vmax.xlane.f32.xlu0 %v506_v55  ;;  %504 = vmax.xlane.f32.xlu1 %v503_v56  ;;  %v266_v55 = vsel %vm234_vm5, %v2054_v43, 0  ;;  %v2079_v56 = vld [vmem:[%s2033_s28 + $0x38] sm:$0xff]  ;;  %v3130_v43 = vlaneseq }
  0x52   : > { %3164 = vst [vmem:[#allocation15_spill] sm:$0xff] %v2079_v56  ;;  %vm237_vm8 = vcmp.ne.s32.totalorder %v2079_v56, 4294967295 }
  0x55   : > { %513 = vmax.xlane.f32.xlu0 %v512_v59  ;;  %510 = vmax.xlane.f32.xlu1 %v509_v60  ;;  %v2082_v59 = vld [vmem:[%s2033_s28 + $0x40] sm:$0xff]  ;;  %v267_v60 = vsel %vm235_vm6, %v2065_v48, 0 }
  0x56   : > { %3165 = vst [vmem:[#allocation16_spill] sm:$0xff] %v2082_v59  ;;  %vm3136_vm9 = vcmp.ne.s32.totalorder %v2082_v59, 4294967295 }
  0x59   : > { %519 = vmax.xlane.f32.xlu0 %v518_v63  ;;  %516 = vmax.xlane.f32.xlu1 %v515_v3  ;;  %v268_v63 = vsel %vm236_vm7, %v2068_v51, 0  ;;  %v2093_v3 = vld [vmem:[%s2033_s28 + $0x48] sm:$0xff] }
  0x5a   : > { %3166 = vst [vmem:[#allocation17_spill] sm:$0xff] %v2093_v3  ;;  %vm3135_vm10 = vcmp.ne.s32.totalorder %v2093_v3, 4294967295 }
  0xaa   : > { %v2013_v4 = vpop.xlane.xlu0 %426  ;;  %v2015_v6 = vpop.xlane.xlu1 %432 }
  0xab   : > { %3157 = vst [vmem:[#allocation8_spill] sm:$0xff] %v2013_v4  ;;  %3158 = vst [vmem:[#allocation9_spill] sm:$0xff] %v2015_v6  ;;  %v521_v7 = vsub.f32 %v1854_v0, %v2013_v4  ;;  %v523_v10 = vsub.f32 %v1860_v2, %v2015_v6 }
  0xad   : > { %v553_v11 = vmul.f32 1.442695, %v521_v7  ;;  %v557_v15 = vmul.f32 1.442695, %v523_v10  ;;  %v2096_v7 = vld [vmem:[%s2033_s28 + $0x50] sm:$0xff]  ;;  %v269_v10 = vsel %vm237_vm8, %v2079_v56, 0 }
  0xae   : > { %v2021_v14 = vpop.xlane.xlu0 %429  ;;  %3167 = vst [vmem:[#allocation18_spill] sm:$0xff] %v2096_v7  ;;  %vm3137_vm11 = vcmp.ne.s32.totalorder %v2096_v7, 4294967295 }
  0xaf   : > { %3159 = vst [vmem:[#allocation10_spill] sm:$0xff] %v2021_v14  ;;  %1573 = vpow2.f32 %v553_v11  ;;  %v522_v18 = vsub.f32 %v1857_v1, %v2021_v14  ;;  %v270_v11 = vsel %vm3136_vm9, %v2082_v59, 0  ;;  %v2207_v14 = vld [vmem:[%s2033_s28 + $0xa8] sm:$0xff] }
  0xb0   : > { %1575 = vpow2.f32 %v557_v15  ;;  %v2107_v15 = vld [vmem:[%s2033_s28 + $0x58] sm:$0xff]  ;;  %3184 = vst [vmem:[#allocation35_spill] sm:$0xff] %v2207_v14 }
  0xb1   : > { %v555_v19 = vmul.f32 1.442695, %v522_v18  ;;  %3168 = vst [vmem:[#allocation19_spill] sm:$0xff] %v2107_v15  ;;  %v2110_v18 = vld [vmem:[%s2033_s28 + $0x60] sm:$0xff]  ;;  %vm3039_vm12 = vcmp.ne.s32.totalorder %v2107_v15, 4294967295 }
  0xb2   : > { %3169 = vst [vmem:[#allocation20_spill] sm:$0xff] %v2110_v18  ;;  %vm3038_vm13 = vcmp.ne.s32.totalorder %v2110_v18, 4294967295 }
  0xb3   : > { %1577 = vpow2.f32 %v555_v19  ;;  %v271_v19 = vsel %vm3135_vm10, %v2093_v3, 0 }
  0xb9   : > { %v1574_v22 = vpop.eup %1573 }
  0xba   : > { %v617_v23 = vsel %vm424_vm0, %v1574_v22, 0.0  ;;  %v1576_v26 = vpop.eup %1575  ;;  %v272_v22 = vsel %vm3137_vm11, %v2096_v7, 0 }
  0xbb   : > { %618 = vadd.xlane.f32.xlu0 %v617_v23  ;;  %v623_v31 = vsel %vm424_vm0, %v1576_v26, 0.0  ;;  %v2121_v23 = vld [vmem:[%s2033_s28 + $0x68] sm:$0xff]  ;;  %v2124_v26 = vld [vmem:[%s2033_s28 + $0x70] sm:$0xff] }
  0xbc   : > { %3170 = vst [vmem:[#allocation21_spill] sm:$0xff] %v2121_v23  ;;  %3171 = vst [vmem:[#allocation22_spill] sm:$0xff] %v2124_v26  ;;  %vm3041_vm14 = vcmp.ne.s32.totalorder %v2121_v23, 4294967295  ;;  %vm3040_vm15 = vcmp.ne.s32.totalorder %v2124_v26, 4294967295 }
  0xbd   : > { %v1578_v27 = vpop.eup %1577 }
  0xbe   : > { %v620_v30 = vsel %vm424_vm0, %v1578_v27, 0.0  ;;  %v273_v27 = vsel %vm3039_vm12, %v2107_v15, 0 }
  0xbf   : > { %621 = vadd.xlane.f32.xlu1 %v620_v30  ;;  %v274_v30 = vsel %vm3038_vm13, %v2110_v18, 0 }
  0xc3   : > { %624 = vadd.xlane.f32.xlu1 %v623_v31  ;;  %v2135_v31 = vld [vmem:[%s2033_s28 + $0x78] sm:$0xff] }
  0xc4   : > { %3172 = vst [vmem:[#allocation23_spill] sm:$0xff] %v2135_v31  ;;  %vm3043_vm13 = vcmp.ne.s32.totalorder %v2135_v31, 4294967295 }
  0xd1   : > { %297 = vperm.xlu0 %1571, %v262_v39   ;;  %v2138_v39 = vld [vmem:[%s2033_s28 + $0x98] sm:$0xff] }
  0xd2   : > { %3173 = vst [vmem:[#allocation24_spill] sm:$0xff] %v2138_v39  ;;  %vm3042_vm12 = vcmp.ne.s32.totalorder %v2138_v39, 4294967295 }
  0xd4   : > { %300 = vperm.xlu1 %1572, %v263_v46   ;;  %v275_v46 = vsel %vm3041_vm14, %v2121_v23, 0  ;;  %v2284_v23 = vld [vmem:[%s2033_s28 + $0xf8] sm:$0xff] }
  0xd5   : > { %303 = vperm.xlu0 %1571, %v264_v47   ;;  %v276_v47 = vsel %vm3040_vm15, %v2124_v26, 0  ;;  %3198 = vst [vmem:[#allocation49_spill] sm:$0xff] %v2284_v23 }
  0xd8   : > { %306 = vperm.xlu1 %1572, %v265_v52   ;;  %v2149_v52 = vld [vmem:[%s2033_s28 + $0x80] sm:$0xff] }
  0xd9   : > { %309 = vperm.xlu0 %1571, %v266_v55   ;;  %3174 = vst [vmem:[#allocation25_spill] sm:$0xff] %v2149_v52  ;;  %v2152_v55 = vld [vmem:[%s2033_s28 + $0xc8] sm:$0xff]  ;;  %vm3045_vm15 = vcmp.ne.s32.totalorder %v2149_v52, 4294967295 }
  0xda   : > { %3175 = vst [vmem:[#allocation26_spill] sm:$0xff] %v2152_v55  ;;  %vm3044_vm14 = vcmp.ne.s32.totalorder %v2152_v55, 4294967295 }
  0xdc   : > { %312 = vperm.xlu1 %1572, %v267_v60   ;;  %v277_v60 = vsel %vm3043_vm13, %v2135_v31, 0 }
  0xdd   : > { %315 = vperm.xlu0 %1571, %v268_v63   ;;  %v281_v63 = vsel %vm3042_vm12, %v2138_v39, 0 }
  0xe0   : > { %318 = vperm.xlu1 %1572, %v269_v10   ;;  %v2163_v10 = vld [vmem:[%s2033_s28 + $0x88] sm:$0xff] }
  0xe1   : > { %321 = vperm.xlu0 %1571, %v270_v11   ;;  %3176 = vst [vmem:[#allocation27_spill] sm:$0xff] %v2163_v10  ;;  %v2166_v11 = vld [vmem:[%s2033_s28 + $0xd8] sm:$0xff]  ;;  %vm3050_vm12 = vcmp.ne.s32.totalorder %v2163_v10, 4294967295 }
  0xe2   : > { %3177 = vst [vmem:[#allocation28_spill] sm:$0xff] %v2166_v11  ;;  %vm3047_vm13 = vcmp.ne.s32.totalorder %v2166_v11, 4294967295 }
  0xe4   : > { %324 = vperm.xlu1 %1572, %v271_v19   ;;  %v278_v19 = vsel %vm3045_vm15, %v2149_v52, 0 }
  0xe5   : > { %327 = vperm.xlu0 %1571, %v272_v22   ;;  %v287_v22 = vsel %vm3044_vm14, %v2152_v55, 0 }
  0xe8   : > { %330 = vperm.xlu1 %1572, %v273_v27   ;;  %v2177_v27 = vld [vmem:[%s2033_s28 + $0x90] sm:$0xff] }
  0xe9   : > { %333 = vperm.xlu0 %1571, %v274_v30   ;;  %3178 = vst [vmem:[#allocation29_spill] sm:$0xff] %v2177_v27  ;;  %v2180_v30 = vld [vmem:[%s2033_s28 + $0xe8] sm:$0xff]  ;;  %vm248_vm14 = vcmp.ne.s32.totalorder %v2177_v27, 4294967295 }
  0xea   : > { %3179 = vst [vmem:[#allocation30_spill] sm:$0xff] %v2180_v30  ;;  %vm3057_vm15 = vcmp.ne.s32.totalorder %v2180_v30, 4294967295 }
  0xeb   : > { %v291_v6 = vsel %vm3057_vm15, %v2180_v30, 0  ;;  %v2218_v30 = vld [vmem:[%s2033_s28 + $0xb0] sm:$0xff] }
  0xec   : > { %336 = vperm.xlu1 %1572, %v275_v46   ;;  %v2182_v46 = vpop.xlane.xlu1 %435  ;;  %3187 = vst [vmem:[#allocation38_spill] sm:$0xff] %v2218_v30  ;;  %vm3085_vm15 = vcmp.ne.s32.totalorder %v2218_v30, 4294967295 }
  0xed   : > { %339 = vperm.xlu0 %1571, %v276_v47   ;;  %3180 = vst [vmem:[#allocation31_spill] sm:$0xff] %v2182_v46  ;;  %v279_v47 = vsel %vm3050_vm12, %v2163_v10, 0  ;;  %vm3068_vm12 = vcmp.ne.s32.totalorder %v2207_v14, 4294967295 }
  0xee   : > { %v283_v55 = vsel %vm3068_vm12, %v2207_v14, 0  ;;  %v2238_v14 = vld [vmem:[%s2033_s28 + $0xc0] sm:$0xff] }
  0xef   : > { %3191 = vst [vmem:[#allocation42_spill] sm:$0xff] %v2238_v14  ;;  %vm3082_vm12 = vcmp.ne.s32.totalorder %v2238_v14, 4294967295 }
  0xf0   : > { %342 = vperm.xlu1 %1572, %v277_v60   ;;  %v289_v60 = vsel %vm3047_vm13, %v2166_v11, 0  ;;  %v2204_v4 = vpop.xlane.xlu1 %441 }
  0xf1   : > { %354 = vperm.xlu0 %1571, %v281_v63   ;;  %v2193_v63 = vld [vmem:[%s2033_s28 + $0xa0] sm:$0xff]  ;;  %3183 = vst [vmem:[#allocation34_spill] sm:$0xff] %v2204_v4 }
  0xf2   : > { %3181 = vst [vmem:[#allocation32_spill] sm:$0xff] %v2193_v63  ;;  %vm3062_vm13 = vcmp.ne.s32.totalorder %v2193_v63, 4294967295 }
  0xf4   : > { %345 = vperm.xlu1 %1572, %v278_v19   ;;  %v2195_v19 = vpop.xlane.xlu0 %438  ;;  %v2215_v11 = vpop.xlane.xlu1 %447 }
  0xf5   : > { %372 = vperm.xlu0 %1571, %v287_v22   ;;  %3182 = vst [vmem:[#allocation33_spill] sm:$0xff] %v2195_v19  ;;  %v280_v22 = vsel %vm248_vm14, %v2177_v27, 0  ;;  %3186 = vst [vmem:[#allocation37_spill] sm:$0xff] %v2215_v11 }
  0xf8   : > { %348 = vperm.xlu1 %1572, %v279_v47   ;;  %v282_v47 = vsel %vm3062_vm13, %v2193_v63, 0  ;;  %v2231_v39 = vpop.xlane.xlu1 %453 }
  0xf9   : > { %378 = vperm.xlu0 %1571, %v289_v60   ;;  %v2213_v60 = vpop.xlane.xlu0 %444  ;;  %3190 = vst [vmem:[#allocation41_spill] sm:$0xff] %v2231_v39  ;;  %v530_v48 = vsub.f32 %v1897_v17, %v2231_v39 }
  0xfa   : > { %3185 = vst [vmem:[#allocation36_spill] sm:$0xff] %v2213_v60 }
  0xfb   : > { %v571_v57 = vmul.f32 1.442695, %v530_v48 }
  0xfc   : > { %351 = vperm.xlu1 %1572, %v280_v22   ;;  %v524_v22 = vsub.f32 %v1867_v5, %v2182_v46  ;;  %v2248_v52 = vpop.xlane.xlu1 %459 }
  0xfd   : > { %384 = vperm.xlu0 %1571, %v291_v6   ;;  %v2225_v6 = vld [vmem:[%s2033_s28 + $0xb8] sm:$0xff]  ;;  %v2229_v63 = vpop.xlane.xlu0 %450  ;;  %3193 = vst [vmem:[#allocation44_spill] sm:$0xff] %v2248_v52 }
  0xfe   : > { %3188 = vst [vmem:[#allocation39_spill] sm:$0xff] %v2225_v6  ;;  %3189 = vst [vmem:[#allocation40_spill] sm:$0xff] %v2229_v63  ;;  %vm3076_vm13 = vcmp.ne.s32.totalorder %v2225_v6, 4294967295  ;;  %v559_v27 = vmul.f32 1.442695, %v524_v22  ;;  %v527_v22 = vsub.f32 %v1884_v12, %v2213_v60 }
  0xff   : > { %v285_v46 = vsel %vm3076_vm13, %v2225_v6, 0  ;;  %v2260_v6 = vld [vmem:[%s2033_s28 + $0xe0] sm:$0xff] }
 0x100   : > { %357 = vperm.xlu1 %1572, %v282_v47   ;;  %v284_v47 = vsel %vm3085_vm15, %v2218_v30, 0  ;;  %v2251_v30 = vld [vmem:[%s2033_s28 + $0xd0] sm:$0xff]  ;;  %1579 = vpow2.f32 %v559_v27  ;;  %3195 = vst [vmem:[#allocation46_spill] sm:$0xff] %v2260_v6  ;;  %v565_v31 = vmul.f32 1.442695, %v527_v22  ;;  %v528_v27 = vsub.f32 %v1887_v13, %v2215_v11 }
 0x101   : > { %v2246_v10 = vpop.xlane.xlu0 %456  ;;  %3194 = vst [vmem:[#allocation45_spill] sm:$0xff] %v2251_v30  ;;  %vm3132_vm13 = vcmp.ne.s32.totalorder %v2251_v30, 4294967295 }
 0x102   : > { %3192 = vst [vmem:[#allocation43_spill] sm:$0xff] %v2246_v10  ;;  %v288_v60 = vsel %vm3132_vm13, %v2251_v30, 0 }
 0x104   : > { %360 = vperm.xlu1 %1572, %v283_v55   ;;  %v526_v55 = vsub.f32 %v1874_v8, %v2204_v4  ;;  %v286_v4 = vsel %vm3082_vm12, %v2238_v14, 0  ;;  %vm3093_vm12 = vcmp.ne.s32.totalorder %v2260_v6, 4294967295  ;;  %v2273_v14 = vld [vmem:[%s2033_s28 + $0xf0] sm:$0xff] }
 0x105   : > { %3197 = vst [vmem:[#allocation48_spill] sm:$0xff] %v2273_v14  ;;  %vm3131_vm15 = vcmp.ne.s32.totalorder %v2273_v14, 4294967295 }
 0x108   : > { %363 = vperm.xlu1 %1572, %v284_v47   ;;  %v563_v47 = vmul.f32 1.442695, %v526_v55  ;;  %v2266_v55 = vpop.xlane.xlu1 %465 }
 0x10a   : > { %1581 = vpow2.f32 %v563_v47  ;;  %v290_v47 = vsel %vm3093_vm12, %v2260_v6, 0  ;;  %v1580_v22 = vpop.eup %1579  ;;  %vm3128_vm12 = vcmp.ne.s32.totalorder %v2284_v23, 4294967295 }
 0x10b   : > { %1583 = vpow2.f32 %v565_v31  ;;  %v626_v30 = vsel %vm424_vm0, %v1580_v22, 0.0  ;;  %v292_v31 = vsel %vm3131_vm15, %v2273_v14, 0 }
 0x10c   : > { %366 = vperm.xlu1 %1572, %v285_v46   ;;  %v2264_v46 = vpop.xlane.xlu0 %462  ;;  %v2281_v26 = vpop.xlane.xlu1 %471 }
 0x10d   : > { %3196 = vst [vmem:[#allocation47_spill] sm:$0xff] %v2264_v46 }
 0x110   : > { %369 = vperm.xlu1 %1572, %v286_v4   ;;  %v567_v4 = vmul.f32 1.442695, %v528_v27  ;;  %v2279_v11 = vpop.xlane.xlu0 %468  ;;  %v2293_v6 = vpop.xlane.xlu1 %477 }
 0x112   : > { %1585 = vpow2.f32 %v567_v4  ;;  %v293_v4 = vsel %vm3128_vm12, %v2284_v23, 0  ;;  %v525_v23 = vsub.f32 %v1877_v9, %v2195_v19  ;;  %v529_v19 = vsub.f32 %v1894_v16, %v2229_v63 }
 0x114   : > { %375 = vperm.xlu1 %1572, %v288_v60   ;;  %v1582_v60 = vpop.eup %1581  ;;  %v2291_v27 = vpop.xlane.xlu0 %474 }
 0x115   : > { %v632_v18 = vsel %vm424_vm0, %v1582_v60, 0.0 }
 0x118   : > { %381 = vperm.xlu1 %1572, %v290_v47   ;;  %v1584_v47 = vpop.eup %1583  ;;  %v2300_v15 = vpop.xlane.xlu0 %483 }
 0x119   : > { %v635_v22 = vsel %vm424_vm0, %v1584_v47, 0.0  ;;  %v561_v47 = vmul.f32 1.442695, %v525_v23  ;;  %v569_v23 = vmul.f32 1.442695, %v529_v19 }
 0x11b   : > { %1587 = vpow2.f32 %v561_v47 }
 0x11c   : > { %627 = vadd.xlane.f32.xlu0 %v626_v30  ;;  %387 = vperm.xlu1 %1572, %v292_v31   ;;  %v1586_v14 = vpop.eup %1585  ;;  %v2302_v30 = vpop.xlane.xlu1 %480  ;;  %1589 = vpow2.f32 %v569_v23  ;;  %v533_v23 = vsub.f32 %v1914_v24, %v2264_v46 }
 0x11d   : > { %v638_v31 = vsel %vm424_vm0, %v1586_v14, 0.0  ;;  %v2305_v7 = vpop.xlane.xlu0 %489  ;;  %1591 = vpow2.f32 %v571_v57 }
 0x11e   : > { %3199 = vst [vmem:[#allocation50_spill] sm:$0xff] %v2305_v7 }
 0x120   : > { %633 = vadd.xlane.f32.xlu0 %v632_v18  ;;  %390 = vperm.xlu1 %1572, %v293_v4   ;;  %v2307_v60 = vpop.xlane.xlu1 %486 }
 0x121   : > { %3200 = vst [vmem:[#allocation51_spill] sm:$0xff] %v2307_v60  ;;  %v2311_v18 = vpop.xlane.xlu0 %495 }
 0x122   : > { %3201 = vst [vmem:[#allocation52_spill] sm:$0xff] %v2311_v18 }
 0x124   : > { %636 = vadd.xlane.f32.xlu0 %v635_v22  ;;  %v2313_v4 = vpop.xlane.xlu1 %492 }
 0x125   : > { %3202 = vst [vmem:[#allocation53_spill] sm:$0xff] %v2313_v4  ;;  %v2315_v3 = vpop.xlane.xlu0 %501 }
 0x126   : > { %3203 = vst [vmem:[#allocation54_spill] sm:$0xff] %v2315_v3 }
 0x128   : > { %639 = vadd.xlane.f32.xlu0 %v638_v31  ;;  %v2317_v59 = vpop.xlane.xlu1 %498  ;;  %v1588_v31 = vpop.eup %1587 }
 0x129   : > { %3204 = vst [vmem:[#allocation55_spill] sm:$0xff] %v2317_v59  ;;  %v2319_v22 = vpop.xlane.xlu0 %507  ;;  %v629_v61 = vsel %vm424_vm0, %v1588_v31, 0.0  ;;  %v532_v31 = vsub.f32 %v1907_v21, %v2248_v52  ;;  %v577_v52 = vmul.f32 1.442695, %v533_v23  ;;  %v535_v23 = vsub.f32 %v1924_v28, %v2279_v11 }
 0x12a   : > { %3205 = vst [vmem:[#allocation56_spill] sm:$0xff] %v2319_v22 }
 0x12b   : > { %v575_v48 = vmul.f32 1.442695, %v532_v31 }
 0x12c   : > { %v2321_v14 = vpop.xlane.xlu1 %504 }
 0x12d   : > { %3206 = vst [vmem:[#allocation57_spill] sm:$0xff] %v2321_v14  ;;  %v2323_v56 = vpop.xlane.xlu0 %513 }
 0x12e   : > { %3207 = vst [vmem:[#allocation58_spill] sm:$0xff] %v2323_v56  ;;  %v531_v56 = vsub.f32 %v1904_v20, %v2246_v10 }
 0x130   : > { %v2325_v51 = vpop.xlane.xlu1 %510  ;;  %v573_v19 = vmul.f32 1.442695, %v531_v56 }
 0x131   : > { %3208 = vst [vmem:[#allocation59_spill] sm:$0xff] %v2325_v51  ;;  %v2332_v47 = vpop.xlane.xlu0 %519 }
 0x132   : > { %3209 = vst [vmem:[#allocation60_spill] sm:$0xff] %v2332_v47  ;;  %1593 = vpow2.f32 %v573_v19 }
 0x133   : > { %1595 = vpow2.f32 %v575_v48 }
 0x134   : > { %v2334_v62 = vpop.xlane.xlu1 %516  ;;  %1597 = vpow2.f32 %v577_v52  ;;  %v536_v52 = vsub.f32 %v1927_v29, %v2281_v26 }
 0x135   : > { %3210 = vst [vmem:[#allocation61_spill] sm:$0xff] %v2334_v62 }
 0x144   : > { %630 = vadd.xlane.f32.xlu1 %v629_v61  ;;  %v2343_v61 = vand.u32 127, %v3130_v43 }
 0x146   : > { %3212 = vst [vmem:[#allocation63_spill] sm:$0xff] %v2343_v61 }
 0x148   : > { %v2338_v42 = vpop.xlane.xlu0 %618 }
 0x149   : > { %3211 = vst [vmem:[#allocation62_spill] sm:$0xff] %v2338_v42  ;;  %v1590_v42 = vpop.eup %1589 }
 0x14c   : > { %v2340_v63 = vpop.xlane.xlu1 %621 }
 0x150   : > { %v2347_v39 = vpop.xlane.xlu1 %624  ;;  %v298_v47 = vpop.permute.xlu0 %297 }
 0x151   : > { %vm392_vm12 = vcmp.eq.s32.totalorder %v2343_v61, %v298_v47  ;;  %v534_v47 = vsub.f32 %v1917_v25, %v2266_v55 }
 0x152   : > { %v809_v10 = vsel %vm392_vm12, %v1854_v0, 0.0  ;;  %v641_v0 = vsel %vm424_vm0, %v1590_v42, 0.0 }
 0x153   : > { %v841_v43 = vsel %vm424_vm0, %v809_v10, 0.0  ;;  %v1592_v10 = vpop.eup %1591  ;;  %v579_v48 = vmul.f32 1.442695, %v534_v47 }
 0x154   : > { %v301_v57 = vpop.permute.xlu1 %300  ;;  %842 = vadd.xlane.f32.xlu0 %v841_v43  ;;  %v304_v56 = vpop.permute.xlu0 %303 }
 0x155   : > { %vm393_vm15 = vcmp.eq.s32.totalorder %v2343_v61, %v301_v57  ;;  %vm394_vm13 = vcmp.eq.s32.totalorder %v2343_v61, %v304_v56  ;;  %1599 = vpow2.f32 %v579_v48  ;;  %v537_v48 = vsub.f32 %v1934_v32, %v2291_v27 }
 0x156   : > { %v810_v19 = vsel %vm393_vm15, %v1857_v1, 0.0  ;;  %v811_v43 = vsel %vm394_vm13, %v1860_v2, 0.0  ;;  %v644_v1 = vsel %vm424_vm0, %v1592_v10, 0.0  ;;  %v581_v2 = vmul.f32 1.442695, %v535_v23 }
 0x157   : > { %v844_v31 = vsel %vm424_vm0, %v810_v19, 0.0  ;;  %v847_v56 = vsel %vm424_vm0, %v811_v43, 0.0  ;;  %v1594_v19 = vpop.eup %1593 }
 0x158   : > { %v307_v46 = vpop.permute.xlu1 %306  ;;  %845 = vadd.xlane.f32.xlu1 %v844_v31  ;;  %642 = vadd.xlane.f32.xlu0 %v641_v0  ;;  %v310_v57 = vpop.permute.xlu0 %309  ;;  %1601 = vpow2.f32 %v581_v2 }
 0x159   : > { %vm395_vm12 = vcmp.eq.s32.totalorder %v2343_v61, %v307_v46  ;;  %vm396_vm13 = vcmp.eq.s32.totalorder %v2343_v61, %v310_v57  ;;  %v647_v46 = vsel %vm424_vm0, %v1594_v19, 0.0  ;;  %v1596_v0 = vpop.eup %1595 }
 0x15a   : > { %v812_v31 = vsel %vm395_vm12, %v1867_v5, 0.0  ;;  %v813_v43 = vsel %vm396_vm13, %v1877_v9, 0.0  ;;  %v583_v5 = vmul.f32 1.442695, %v536_v52  ;;  %v650_v57 = vsel %vm424_vm0, %v1596_v0, 0.0 }
 0x15b   : > { %v850_v47 = vsel %vm424_vm0, %v812_v31, 0.0  ;;  %v585_v9 = vmul.f32 1.442695, %v537_v48 }
 0x15c   : > { %v313_v42 = vpop.permute.xlu1 %312  ;;  %645 = vadd.xlane.f32.xlu0 %v644_v1  ;;  %848 = vadd.xlane.f32.xlu1 %v847_v56  ;;  %v316_v23 = vpop.permute.xlu0 %315  ;;  %v853_v1 = vsel %vm424_vm0, %v813_v43, 0.0  ;;  %1603 = vpow2.f32 %v583_v5  ;;  %v539_v43 = vsub.f32 %v1947_v37, %v2302_v30 }
 0x15d   : > { %vm397_vm15 = vcmp.eq.s32.totalorder %v2343_v61, %v313_v42  ;;  %v1598_v56 = vpop.eup %1597  ;;  %vm398_vm12 = vcmp.eq.s32.totalorder %v2343_v61, %v316_v23  ;;  %v538_v42 = vsub.f32 %v1937_v33, %v2293_v6  ;;  %1605 = vpow2.f32 %v585_v9 }
 0x15e   : > { %v814_v31 = vsel %vm397_vm15, %v1874_v8, 0.0  ;;  %v653_v2 = vsel %vm424_vm0, %v1598_v56, 0.0  ;;  %v815_v0 = vsel %vm398_vm12, %v1884_v12, 0.0  ;;  %v540_v12 = vsub.f32 %v1944_v36, %v2300_v15 }
 0x15f   : > { %v856_v52 = vsel %vm424_vm0, %v814_v31, 0.0  ;;  %v587_v8 = vmul.f32 1.442695, %v538_v42  ;;  %v859_v23 = vsel %vm424_vm0, %v815_v0, 0.0 }
 0x160   : > { %v319_v10 = vpop.permute.xlu1 %318  ;;  %648 = vadd.xlane.f32.xlu0 %v647_v46  ;;  %851 = vadd.xlane.f32.xlu1 %v850_v47  ;;  %v1600_v46 = vpop.eup %1599 }
 0x161   : > { %vm399_vm13 = vcmp.eq.s32.totalorder %v2343_v61, %v319_v10  ;;  %v322_v5 = vpop.permute.xlu0 %321  ;;  %v656_v48 = vsel %vm424_vm0, %v1600_v46, 0.0  ;;  %1607 = vpow2.f32 %v587_v8  ;;  %v589_v10 = vmul.f32 1.442695, %v539_v43 }
 0x162   : > { %v816_v56 = vsel %vm399_vm13, %v1887_v13, 0.0  ;;  %vm400_vm15 = vcmp.eq.s32.totalorder %v2343_v61, %v322_v5  ;;  %v541_v13 = vsub.f32 %v1957_v41, %v2307_v60 }
 0x163   : > { %v862_v9 = vsel %vm424_vm0, %v816_v56, 0.0  ;;  %1609 = vpow2.f32 %v589_v10 }
 0x164   : > { %v325_v19 = vpop.permute.xlu1 %324  ;;  %651 = vadd.xlane.f32.xlu0 %v650_v57  ;;  %854 = vadd.xlane.f32.xlu1 %v853_v1  ;;  %v1602_v57 = vpop.eup %1601 }
 0x165   : > { %v659_v31 = vsel %vm424_vm0, %v1602_v57, 0.0  ;;  %vm401_vm12 = vcmp.eq.s32.totalorder %v2343_v61, %v325_v19  ;;  %v328_v46 = vpop.permute.xlu0 %327  ;;  %v593_v19 = vmul.f32 1.442695, %v541_v13 }
 0x166   : > { %v1604_v42 = vpop.eup %1603  ;;  %vm402_vm13 = vcmp.eq.s32.totalorder %v2343_v61, %v328_v46 }
 0x167   : > { %v662_v8 = vsel %vm424_vm0, %v1604_v42, 0.0  ;;  %v1606_v5 = vpop.eup %1605  ;;  %v819_v10 = vsel %vm402_vm13, %v1904_v20, 0.0  ;;  %v544_v20 = vsub.f32 %v1964_v44, %v2311_v18  ;;  %v545_v44 = vsub.f32 %v1977_v50, %v2317_v59 }
 0x168   : > { %v331_v47 = vpop.permute.xlu1 %330  ;;  %654 = vadd.xlane.f32.xlu0 %v653_v2  ;;  %857 = vadd.xlane.f32.xlu1 %v856_v52  ;;  %v817_v2 = vsel %vm400_vm15, %v1894_v16, 0.0  ;;  %v591_v52 = vmul.f32 1.442695, %v540_v12  ;;  %v542_v16 = vsub.f32 %v1954_v40, %v2305_v7  ;;  %v871_v42 = vsel %vm424_vm0, %v819_v10, 0.0 }
 0x169   : > { %v865_v43 = vsel %vm424_vm0, %v817_v2, 0.0  ;;  %vm403_vm15 = vcmp.eq.s32.totalorder %v2343_v61, %v331_v47  ;;  %v334_v40 = vpop.permute.xlu0 %333 }
 0x16a   : > { %1611 = vpow2.f32 %v591_v52  ;;  %v820_v52 = vsel %vm403_vm15, %v1907_v21, 0.0  ;;  %v599_v21 = vmul.f32 1.442695, %v544_v20 }
 0x16b   : > { %v1608_v56 = vpop.eup %1607  ;;  %1613 = vpow2.f32 %v593_v19  ;;  %v874_v46 = vsel %vm424_vm0, %v820_v52, 0.0 }
 0x16c   : > { %v2391_v1 = vpop.permute.xlu1 %336  ;;  %657 = vadd.xlane.f32.xlu0 %v656_v48  ;;  %860 = vadd.xlane.f32.xlu1 %v859_v23  ;;  %v818_v48 = vsel %vm401_vm12, %v1897_v17, 0.0  ;;  %v665_v23 = vsel %vm424_vm0, %v1606_v5, 0.0  ;;  %v595_v17 = vmul.f32 1.442695, %v542_v16  ;;  %vm404_vm12 = vcmp.eq.s32.totalorder %v2343_v61, %v334_v40 }
 0x16d   : > { %v868_v57 = vsel %vm424_vm0, %v818_v48, 0.0  ;;  %v1610_v2 = vpop.eup %1609  ;;  %vm405_vm13 = vcmp.eq.s32.totalorder %v2343_v61, %v2391_v1  ;;  %v340_v5 = vpop.permute.xlu0 %339  ;;  %v601_v1 = vmul.f32 1.442695, %v545_v44 }
 0x16e   : > { %1615 = vpow2.f32 %v595_v17  ;;  %vm406_vm15 = vcmp.eq.s32.totalorder %v2343_v61, %v340_v5  ;;  %v549_v5 = vsub.f32 %v1997_v58, %v2325_v51  ;;  %v3214_v58 = vld [vmem:[#allocation58_spill] sm:$0xff]  ;;  %v3256_v51 = vld [vmem:[#allocation45_spill] sm:$0xff] }
 0x16f   : > { %v823_v17 = vsel %vm406_vm15, %v1924_v28, 0.0  ;;  %vm1097_vm15 = vcmask 7168  }
 0x170   : > { %660 = vadd.xlane.f32.xlu0 %v659_v31  ;;  %863 = vadd.xlane.f32.xlu1 %v862_v9  ;;  %v2403_v0 = vpop.permute.xlu1 %342  ;;  %v543_v31 = vsub.f32 %v1967_v45, %v2313_v4  ;;  %v668_v9 = vsel %vm424_vm0, %v1608_v56, 0.0  ;;  %v671_v45 = vsel %vm424_vm0, %v1610_v2, 0.0  ;;  %v3150_v2 = vmov 0.0  }
 0x171   : > { %v1488_v28 = vsel %vm230_vm1, 1.0, %v3150_v2 }
 0x172   : > { %v597_v47 = vmul.f32 1.442695, %v543_v31  ;;  %v547_v31 = vsub.f32 %v1987_v54, %v2321_v14  ;;  %v548_v54 = vsub.f32 %v1984_v53, %v2319_v22 }
 0x174   : > { %663 = vadd.xlane.f32.xlu0 %v662_v8  ;;  %866 = vadd.xlane.f32.xlu1 %v865_v43  ;;  %v2413_v12 = vpop.permute.xlu1 %345  ;;  %v1612_v8 = vpop.eup %1611  ;;  %v821_v43 = vsel %vm404_vm12, %v1914_v24, 0.0  ;;  %1617 = vpow2.f32 %v597_v47  ;;  %v546_v24 = vsub.f32 %v1974_v49, %v2315_v3  ;;  %vm407_vm12 = vcmp.eq.s32.totalorder %v2343_v61, %v2403_v0 }
 0x175   : > { %v674_v48 = vsel %vm424_vm0, %v1612_v8, 0.0  ;;  %v877_v16 = vsel %vm424_vm0, %v821_v43, 0.0  ;;  %v1614_v19 = vpop.eup %1613  ;;  %1619 = vpow2.f32 %v599_v21  ;;  %v1489_v0 = vsel %vm231_vm2, 1.0, %v3150_v2 }
 0x176   : > { %v677_v50 = vsel %vm424_vm0, %v1614_v19, 0.0  ;;  %1621 = vpow2.f32 %v601_v1  ;;  %v824_v52 = vsel %vm407_vm12, %v1927_v29, 0.0  ;;  %v605_v20 = vmul.f32 1.442695, %v547_v31 }
 0x177   : > { %v1306_v47 = vsel %vm1097_vm15, %v1488_v28, 0.0  ;;  %v886_v8 = vsel %vm424_vm0, %v824_v52, 0.0  ;;  %v1490_v43 = vsel %vm232_vm3, 1.0, %v3150_v2  ;;  %v607_v44 = vmul.f32 1.442695, %v548_v54  ;;  %v3217_v54 = vld [vmem:[#allocation7_spill] sm:$0xff] }
 0x178   : > { %666 = vadd.xlane.f32.xlu0 %v665_v23  ;;  %869 = vadd.xlane.f32.xlu1 %v868_v57  ;;  %v2425_v13 = vpop.permute.xlu1 %348  ;;  %v822_v23 = vsel %vm405_vm13, %v1917_v25, 0.0  ;;  %v1616_v10 = vpop.eup %1615  ;;  %v603_v25 = vmul.f32 1.442695, %v546_v24  ;;  %vm408_vm13 = vcmp.eq.s32.totalorder %v2343_v61, %v2413_v12  ;;  %v1491_v24 = vsel %vm233_vm4, 1.0, %v3150_v2 }
 0x179   : > { %v880_v56 = vsel %vm424_vm0, %v822_v23, 0.0  ;;  %v680_v49 = vsel %vm424_vm0, %v1616_v10, 0.0  ;;  %v825_v12 = vsel %vm408_vm13, %v1934_v32, 0.0  ;;  %vm409_vm12 = vcmp.eq.s32.totalorder %v2343_v61, %v2425_v13 }
 0x17a   : > { %1623 = vpow2.f32 %v603_v25  ;;  %v889_v19 = vsel %vm424_vm0, %v825_v12, 0.0  ;;  %v826_v1 = vsel %vm409_vm12, %v1937_v33, 0.0  ;;  %v609_v10 = vmul.f32 1.442695, %v549_v5  ;;  %v3220_v5 = vld [vmem:[#allocation6_spill] sm:$0xff] }
 0x17b   : > { %1625 = vpow2.f32 %v605_v20  ;;  %v1311_v31 = vsel %vm1097_vm15, %v1491_v24, 0.0  ;;  %v1492_v28 = vsel %vm234_vm5, 1.0, %v3150_v2  ;;  %v551_v20 = vsub.f32 %v3217_v54, %v2334_v62 }
 0x17c   : > { %669 = vadd.xlane.f32.xlu0 %v668_v9  ;;  %872 = vadd.xlane.f32.xlu1 %v871_v42  ;;  %v2437_v57 = vpop.permute.xlu1 %351  ;;  %v883_v9 = vsel %vm424_vm0, %v823_v17, 0.0  ;;  %1627 = vpow2.f32 %v607_v44  ;;  %v355_v17 = vpop.permute.xlu0 %354  ;;  %v3219_v44 = vld [vmem:[#allocation60_spill] sm:$0xff] }
 0x17d   : > { %vm410_vm13 = vcmp.eq.s32.totalorder %v2343_v61, %v2437_v57  ;;  %vm411_vm12 = vcmp.eq.s32.totalorder %v2343_v61, %v355_v17  ;;  %1629 = vpow2.f32 %v609_v10 }
 0x17e   : > { %v1618_v42 = vpop.eup %1617  ;;  %v827_v57 = vsel %vm410_vm13, %v1947_v37, 0.0  ;;  %v1493_v37 = vsel %vm235_vm6, 1.0, %v3150_v2 }
 0x17f   : > { %v1620_v29 = vpop.eup %1619 }
 0x180   : > { %672 = vadd.xlane.f32.xlu0 %v671_v45  ;;  %875 = vadd.xlane.f32.xlu1 %v874_v46  ;;  %v2449_v40 = vpop.permute.xlu1 %357  ;;  %v1307_v45 = vsel %vm1097_vm15, %v1489_v0, 0.0  ;;  %v683_v46 = vsel %vm424_vm0, %v1618_v42, 0.0  ;;  %v1622_v32 = vpop.eup %1621 }
 0x181   : > { %v1308_v53 = vadd.f32 %v1307_v45, %v1306_v47  ;;  %v1313_v47 = vsel %vm1097_vm15, %v1492_v28, 0.0  ;;  %vm412_vm13 = vcmp.eq.s32.totalorder %v2343_v61, %v2449_v40  ;;  %v1701_v28 = vld [vmem:[%s1851_s25 + $0xa8] sm:$0xff] }
 0x182   : > { %v829_v40 = vsel %vm412_vm13, %v1957_v41, 0.0  ;;  %v1495_v41 = vsel %vm237_vm8, 1.0, %v3150_v2 }
 0x184   : > { %675 = vadd.xlane.f32.xlu0 %v674_v48  ;;  %878 = vadd.xlane.f32.xlu1 %v877_v16  ;;  %v2472_v21 = vpop.permute.xlu1 %360  ;;  %v1309_v48 = vsel %vm1097_vm15, %v1490_v43, 0.0  ;;  %v686_v16 = vsel %vm424_vm0, %v1620_v29, 0.0  ;;  %v1624_v33 = vpop.eup %1623  ;;  %v828_v43 = vsel %vm411_vm12, %v1944_v36, 0.0 }
 0x185   : > { %v1310_v13 = vadd.f32 %v1309_v48, %v1308_v53  ;;  %v692_v45 = vsel %vm424_vm0, %v1624_v33, 0.0  ;;  %v552_v48 = vsub.f32 %v3220_v5, %v3219_v44  ;;  %v898_v24 = vsel %vm424_vm0, %v828_v43, 0.0  ;;  %v373_v43 = vpop.permute.xlu0 %372  ;;  %v3253_v44 = vld [vmem:[#allocation62_spill] sm:$0xff] }
 0x186   : > { %vm413_vm12 = vcmp.eq.s32.totalorder %v2343_v61, %v2472_v21 }
 0x187   : > { %v1312_v0 = vadd.f32 %v1311_v31, %v1310_v13  ;;  %v1494_v13 = vsel %vm236_vm7, 1.0, %v3150_v2 }
 0x188   : > { %678 = vadd.xlane.f32.xlu0 %v677_v50  ;;  %881 = vadd.xlane.f32.xlu1 %v880_v56  ;;  %v3215_v50 = vld [vmem:[#allocation5_spill] sm:$0xff]  ;;  %v364_v25 = vpop.permute.xlu1 %363  ;;  %v1317_v17 = vsel %vm1097_vm15, %v1494_v13, 0.0 }
 0x189   : > { %v550_v56 = vsub.f32 %v3215_v50, %v3214_v58  ;;  %v1314_v53 = vadd.f32 %v1313_v47, %v1312_v0  ;;  %vm414_vm13 = vcmp.eq.s32.totalorder %v2343_v61, %v364_v25  ;;  %v1319_v0 = vsel %vm1097_vm15, %v1495_v41, 0.0  ;;  %v3223_v47 = vld [vmem:[#allocation16_spill] sm:$0xff]  ;;  %v1704_v41 = vld [vmem:[%s1851_s25 + $0xc0] sm:$0xff] }
 0x18b   : > { %v611_v52 = vmul.f32 1.442695, %v550_v56  ;;  %v615_v56 = vmul.f32 1.442695, %v552_v48 }
 0x18c   : > { %681 = vadd.xlane.f32.xlu0 %v680_v49  ;;  %884 = vadd.xlane.f32.xlu1 %v883_v9  ;;  %v689_v49 = vsel %vm424_vm0, %v1622_v32, 0.0  ;;  %v892_v9 = vsel %vm424_vm0, %v826_v1, 0.0  ;;  %v367_v12 = vpop.permute.xlu1 %366 }
 0x18d   : > { %1631 = vpow2.f32 %v611_v52 }
 0x190   : > { %684 = vadd.xlane.f32.xlu0 %v683_v46  ;;  %887 = vadd.xlane.f32.xlu1 %v886_v8  ;;  %v895_v46 = vsel %vm424_vm0, %v827_v57, 0.0  ;;  %v1626_v8 = vpop.eup %1625  ;;  %v370_v10 = vpop.permute.xlu1 %369  ;;  %v830_v57 = vsel %vm413_vm12, %v1701_v28, 0.0  ;;  %vm415_vm12 = vcmp.eq.s32.totalorder %v2343_v61, %v367_v12 }
 0x191   : > { %v695_v32 = vsel %vm424_vm0, %v1626_v8, 0.0  ;;  %v1628_v36 = vpop.eup %1627  ;;  %v904_v54 = vsel %vm424_vm0, %v830_v57, 0.0 }
 0x192   : > { %v698_v31 = vsel %vm424_vm0, %v1628_v36, 0.0 }
 0x194   : > { %687 = vadd.xlane.f32.xlu0 %v686_v16  ;;  %890 = vadd.xlane.f32.xlu1 %v889_v19  ;;  %v613_v16 = vmul.f32 1.442695, %v551_v20  ;;  %v1315_v19 = vsel %vm1097_vm15, %v1493_v37, 0.0  ;;  %v376_v37 = vpop.permute.xlu1 %375 }
 0x195   : > { %v1316_v50 = vadd.f32 %v1315_v19, %v1314_v53  ;;  %v3224_v19 = vld [vmem:[#allocation17_spill] sm:$0xff] }
 0x196   : > { %1633 = vpow2.f32 %v613_v16 }
 0x197   : > { %v1318_v21 = vadd.f32 %v1317_v17, %v1316_v50  ;;  %1635 = vpow2.f32 %v615_v56 }
 0x198   : > { %690 = vadd.xlane.f32.xlu0 %v689_v49  ;;  %893 = vadd.xlane.f32.xlu1 %v892_v9  ;;  %v901_v49 = vsel %vm424_vm0, %v829_v40, 0.0  ;;  %v1630_v9 = vpop.eup %1629  ;;  %v382_v13 = vpop.permute.xlu1 %381  ;;  %1637 = vlog2.f32 %v2340_v63 }
 0x199   : > { %v701_v52 = vsel %vm424_vm0, %v1630_v9, 0.0  ;;  %v1632_v20 = vpop.eup %1631  ;;  %v1320_v25 = vadd.f32 %v1319_v0, %v1318_v21  ;;  %v379_v9 = vpop.permute.xlu0 %378  ;;  %1639 = vlog2.f32 %v3253_v44 }
 0x19a   : > { %v704_v5 = vsel %vm424_vm0, %v1632_v20, 0.0  ;;  %v1705_v20 = vld [vmem:[%s1851_s25 + $0xc8] sm:$0xff]  ;;  %1641 = vlog2.f32 %v2347_v39 }
 0x19c   : > { %693 = vadd.xlane.f32.xlu0 %v692_v45  ;;  %896 = vadd.xlane.f32.xlu1 %v895_v46  ;;  %v1496_v45 = vsel %vm3136_vm9, 1.0, %v3150_v2  ;;  %v1702_v46 = vld [vmem:[%s1851_s25 + $0xb0] sm:$0xff] }
 0x19d   : > { %v831_v8 = vsel %vm414_vm13, %v1702_v46, 0.0  ;;  %v1321_v53 = vsel %vm1097_vm15, %v1496_v45, 0.0  ;;  %vm416_vm13 = vcmp.eq.s32.totalorder %v2343_v61, %v370_v10  ;;  %v1706_v46 = vld [vmem:[%s1851_s25 + $0xd0] sm:$0xff] }
 0x19e   : > { %v907_v48 = vsel %vm424_vm0, %v831_v8, 0.0  ;;  %v1322_v12 = vadd.f32 %v1321_v53, %v1320_v25  ;;  %v833_v28 = vsel %vm416_vm13, %v1704_v41, 0.0  ;;  %v388_v25 = vpop.permute.xlu1 %387  ;;  %vm419_vm13 = vcmp.eq.s32.totalorder %v2343_v61, %v379_v9  ;;  %v3230_v9 = vld [vmem:[#allocation21_spill] sm:$0xff] }
 0x19f   : > { %v913_v0 = vsel %vm424_vm0, %v833_v28, 0.0  ;;  %v1709_v28 = vld [vmem:[%s1851_s25 + $0xe8] sm:$0xff] }
 0x1a0   : > { %696 = vadd.xlane.f32.xlu0 %v695_v32  ;;  %899 = vadd.xlane.f32.xlu1 %v898_v24  ;;  %v1634_v16 = vpop.eup %1633  ;;  %v1497_v32 = vsel %vm3135_vm10, 1.0, %v3150_v2  ;;  %v1703_v24 = vld [vmem:[%s1851_s25 + $0xb8] sm:$0xff]  ;;  %vm418_vm10 = vcmp.eq.s32.totalorder %v2343_v61, %v376_v37 }
 0x1a1   : > { %v832_v36 = vsel %vm415_vm12, %v1703_v24, 0.0  ;;  %v1323_v40 = vsel %vm1097_vm15, %v1497_v32, 0.0  ;;  %v707_v50 = vsel %vm424_vm0, %v1634_v16, 0.0  ;;  %v1636_v17 = vpop.eup %1635  ;;  %vm417_vm12 = vcmp.eq.s32.totalorder %v2343_v61, %v373_v43  ;;  %v385_v43 = vpop.permute.xlu0 %384  ;;  %v3228_v16 = vld [vmem:[#allocation20_spill] sm:$0xff]  ;;  %v1707_v24 = vld [vmem:[%s1851_s25 + $0xd8] sm:$0xff] }
 0x1a2   : > { %v910_v56 = vsel %vm424_vm0, %v832_v36, 0.0  ;;  %v1324_v10 = vadd.f32 %v1323_v40, %v1322_v12  ;;  %v710_v21 = vsel %vm424_vm0, %v1636_v17, 0.0  ;;  %v834_v45 = vsel %vm417_vm12, %v1705_v20, 0.0  ;;  %v1708_v12 = vld [vmem:[%s1851_s25 + $0xe0] sm:$0xff]  ;;  %v1638_v39 = vpop.eup %1637 }
 0x1a3   : > { %v835_v8 = vsel %vm418_vm10, %v1706_v46, 0.0  ;;  %v836_v36 = vsel %vm419_vm13, %v1707_v24, 0.0  ;;  %vm421_vm10 = vcmp.eq.s32.totalorder %v2343_v61, %v385_v43  ;;  %vm422_vm12 = vcmp.eq.s32.totalorder %v2343_v61, %v388_v25  ;;  %v3232_v46 = vld [vmem:[#allocation22_spill] sm:$0xff]  ;;  %v1640_v22 = vpop.eup %1639 }
 0x1a4   : > { %699 = vadd.xlane.f32.xlu0 %v698_v31  ;;  %902 = vadd.xlane.f32.xlu1 %v901_v49  ;;  %v3225_v31 = vld [vmem:[#allocation18_spill] sm:$0xff]  ;;  %v1498_v49 = vsel %vm3137_vm11, 1.0, %v3150_v2  ;;  %vm420_vm11 = vcmp.eq.s32.totalorder %v2343_v61, %v382_v13  ;;  %vm3231_vm13 = vcmp.ne.s32.totalorder %v3230_v9, 4294967295  ;;  %v714_v14 = vmul.f32 0.6931472, %v1640_v22 }
 0x1a5   : > { %v1325_v57 = vsel %vm1097_vm15, %v1498_v49, 0.0  ;;  %v837_v40 = vsel %vm420_vm11, %v1708_v12, 0.0  ;;  %v922_v49 = vsel %vm424_vm0, %v836_v36, 0.0  ;;  %v1501_v41 = vsel %vm3231_vm13, 1.0, %v3150_v2  ;;  %v1711_v25 = vld [vmem:[%s1851_s25 + $0xf8] sm:$0xff]  ;;  %v3236_v12 = vld [vmem:[#allocation25_spill] sm:$0xff] }
 0x1a6   : > { %v1326_v37 = vadd.f32 %v1325_v57, %v1324_v10  ;;  %v925_v17 = vsel %vm424_vm0, %v837_v40, 0.0  ;;  %v838_v10 = vsel %vm421_vm10, %v1709_v28, 0.0  ;;  %v1710_v57 = vld [vmem:[%s1851_s25 + $0xf0] sm:$0xff] }
 0x1a8   : > { %702 = vadd.xlane.f32.xlu0 %v701_v52  ;;  %905 = vadd.xlane.f32.xlu1 %v904_v54  ;;  %v3226_v52 = vld [vmem:[#allocation19_spill] sm:$0xff] }
 0x1a9   : > { %vm3227_vm9 = vcmp.ne.s32.totalorder %v3226_v52, 4294967295 }
 0x1aa   : > { %v1499_v54 = vsel %vm3227_vm9, 1.0, %v3150_v2  ;;  %vm3229_vm9 = vcmp.ne.s32.totalorder %v3228_v16, 4294967295 }
 0x1ab   : > { %v1327_v53 = vsel %vm1097_vm15, %v1499_v54, 0.0  ;;  %v1500_v32 = vsel %vm3229_vm9, 1.0, %v3150_v2  ;;  %v1331_v54 = vsel %vm1097_vm15, %v1501_v41, 0.0  ;;  %vm3233_vm9 = vcmp.ne.s32.totalorder %v3232_v46, 4294967295 }
 0x1ac   : > { %705 = vadd.xlane.f32.xlu0 %v704_v5  ;;  %908 = vadd.xlane.f32.xlu1 %v907_v48  ;;  %v919_v5 = vsel %vm424_vm0, %v835_v8, 0.0  ;;  %v916_v48 = vsel %vm424_vm0, %v834_v45, 0.0  ;;  %v1328_v13 = vadd.f32 %v1327_v53, %v1326_v37  ;;  %v928_v45 = vsel %vm424_vm0, %v838_v10, 0.0 }
 0x1ad   : > { %v1502_v8 = vsel %vm3233_vm9, 1.0, %v3150_v2 }
 0x1ae   : > { %v1333_v53 = vsel %vm1097_vm15, %v1502_v8, 0.0 }
 0x1b0   : > { %708 = vadd.xlane.f32.xlu0 %v707_v50  ;;  %911 = vadd.xlane.f32.xlu1 %v910_v56  ;;  %v391_v50 = vpop.permute.xlu1 %390  ;;  %v1329_v56 = vsel %vm1097_vm15, %v1500_v32, 0.0 }
 0x1b1   : > { %vm423_vm11 = vcmp.eq.s32.totalorder %v2343_v61, %v391_v50 }
 0x1b2   : > { %v840_v37 = vsel %vm423_vm11, %v1711_v25, 0.0 }
 0x1b4   : > { %711 = vadd.xlane.f32.xlu0 %v710_v21  ;;  %914 = vadd.xlane.f32.xlu1 %v913_v0  ;;  %v839_v21 = vsel %vm422_vm12, %v1710_v57, 0.0  ;;  %v1330_v0 = vadd.f32 %v1329_v56, %v1328_v13  ;;  %vm3237_vm12 = vcmp.ne.s32.totalorder %v3236_v12, 4294967295  ;;  %v628_v56 = vpop.xlane.xlu0 %627  ;;  %v1506_v57 = vsel %vm248_vm14, 1.0, %v3150_v2 }
 0x1b5   : > { %v931_v20 = vsel %vm424_vm0, %v839_v21, 0.0  ;;  %v1504_v40 = vsel %vm3237_vm12, 1.0, %v3150_v2  ;;  %1643 = vlog2.f32 %v628_v56  ;;  %v3258_v56 = vld [vmem:[#allocation28_spill] sm:$0xff] }
 0x1b6   : > { %v1332_v43 = vadd.f32 %v1331_v54, %v1330_v0  ;;  %v1337_v50 = vsel %vm1097_vm15, %v1504_v40, 0.0  ;;  %v1341_v54 = vsel %vm1097_vm15, %v1506_v57, 0.0 }
 0x1b8   : > { %920 = vadd.xlane.f32.xlu0 %v919_v5  ;;  %917 = vadd.xlane.f32.xlu1 %v916_v48  ;;  %v934_v5 = vsel %vm424_vm0, %v840_v37, 0.0  ;;  %v3234_v48 = vld [vmem:[#allocation23_spill] sm:$0xff]  ;;  %v1334_v24 = vadd.f32 %v1333_v53, %v1332_v43  ;;  %v634_v21 = vpop.xlane.xlu0 %633  ;;  %v3243_v43 = vld [vmem:[#allocation32_spill] sm:$0xff] }
 0x1b9   : > { %vm3235_vm10 = vcmp.ne.s32.totalorder %v3234_v48, 4294967295  ;;  %vm3244_vm11 = vcmp.ne.s32.totalorder %v3243_v43, 4294967295  ;;  %1645 = vlog2.f32 %v634_v21 }
 0x1ba   : > { %v1503_v32 = vsel %vm3235_vm10, 1.0, %v3150_v2  ;;  %v1508_v53 = vsel %vm3244_vm11, 1.0, %v3150_v2  ;;  %vm3257_vm11 = vcmp.ne.s32.totalorder %v3256_v51, 4294967295 }
 0x1bb   : > { %v1335_v36 = vsel %vm1097_vm15, %v1503_v32, 0.0  ;;  %v1345_v32 = vsel %vm1097_vm15, %v1508_v53, 0.0 }
 0x1bc   : > { %926 = vadd.xlane.f32.xlu0 %v925_v17  ;;  %923 = vadd.xlane.f32.xlu1 %v922_v49  ;;  %v1336_v13 = vadd.f32 %v1335_v36, %v1334_v24  ;;  %v3238_v17 = vld [vmem:[#allocation27_spill] sm:$0xff]  ;;  %v637_v37 = vpop.xlane.xlu0 %636 }
 0x1bd   : > { %vm3239_vm13 = vcmp.ne.s32.totalorder %v3238_v17, 4294967295  ;;  %v3245_v24 = vld [vmem:[#allocation35_spill] sm:$0xff] }
 0x1be   : > { %v1505_v49 = vsel %vm3239_vm13, 1.0, %v3150_v2  ;;  %v1338_v41 = vadd.f32 %v1337_v50, %v1336_v13  ;;  %vm3246_vm9 = vcmp.ne.s32.totalorder %v3245_v24, 4294967295 }
 0x1bf   : > { %v1339_v28 = vsel %vm1097_vm15, %v1505_v49, 0.0  ;;  %v1509_v36 = vsel %vm3246_vm9, 1.0, %v3150_v2  ;;  %v3247_v49 = vld [vmem:[#allocation38_spill] sm:$0xff]  ;;  %vm3259_vm9 = vcmp.ne.s32.totalorder %v3258_v56, 4294967295 }
 0x1c0   : > { %932 = vadd.xlane.f32.xlu0 %v931_v20  ;;  %929 = vadd.xlane.f32.xlu1 %v928_v45  ;;  %v1340_v0 = vadd.f32 %v1339_v28, %v1338_v41  ;;  %v3241_v20 = vld [vmem:[#allocation24_spill] sm:$0xff]  ;;  %v640_v40 = vpop.xlane.xlu0 %639  ;;  %v1347_v50 = vsel %vm1097_vm15, %v1509_v36, 0.0  ;;  %vm3248_vm10 = vcmp.ne.s32.totalorder %v3247_v49, 4294967295  ;;  %v3251_v36 = vld [vmem:[#allocation42_spill] sm:$0xff]  ;;  %v1515_v21 = vsel %vm3259_vm9, 1.0, %v3150_v2 }
 0x1c1   : > { %vm3242_vm0 = vcmp.ne.s32.totalorder %v3241_v20, 4294967295  ;;  %v1510_v41 = vsel %vm3248_vm10, 1.0, %v3150_v2  ;;  %vm3252_vm13 = vcmp.ne.s32.totalorder %v3251_v36, 4294967295  ;;  %v1359_v3 = vsel %vm1097_vm15, %v1515_v21, 0.0  ;;  %v3262_v56 = vld [vmem:[#allocation10_spill] sm:$0xff]  ;;  %v3265_v21 = vld [vmem:[#allocation8_spill] sm:$0xff] }
 0x1c2   : > { %v1507_v45 = vsel %vm3242_vm0, 1.0, %v3150_v2  ;;  %v1342_v8 = vadd.f32 %v1341_v54, %v1340_v0  ;;  %v1349_v54 = vsel %vm1097_vm15, %v1510_v41, 0.0  ;;  %v1512_v61 = vsel %vm3252_vm13, 1.0, %v3150_v2 }
 0x1c3   : > { %v1343_v25 = vsel %vm1097_vm15, %v1507_v45, 0.0  ;;  %v3249_v45 = vld [vmem:[#allocation39_spill] sm:$0xff]  ;;  %v1353_v62 = vsel %vm1097_vm15, %v1512_v61, 0.0  ;;  %vm3290_vm9 = vcmp.ne.s32.totalorder %v3230_v9, 4294967295 }
 0x1c4   : > { %935 = vadd.xlane.f32.xlu1 %v934_v5  ;;  %v1344_v5 = vadd.f32 %v1343_v25, %v1342_v8  ;;  %vm3250_vm12 = vcmp.ne.s32.totalorder %v3249_v45, 4294967295 }
 0x1c5   : > { %v1511_v8 = vsel %vm3250_vm12, 1.0, %v3150_v2 }
 0x1c6   : > { %v1346_v13 = vadd.f32 %v1345_v32, %v1344_v5  ;;  %v1351_v32 = vsel %vm1097_vm15, %v1511_v8, 0.0 }
 0x1c8   : > { %v1348_v0 = vadd.f32 %v1347_v50, %v1346_v13 }
 0x1ca   : > { %v1350_v5 = vadd.f32 %v1349_v54, %v1348_v0  ;;  %v3254_v0 = vld [vmem:[#allocation26_spill] sm:$0xff] }
 0x1cb   : > { %vm3255_vm0 = vcmp.ne.s32.totalorder %v3254_v0, 4294967295 }
 0x1cc   : > { %v1352_v41 = vadd.f32 %v1351_v32, %v1350_v5  ;;  %v1513_v54 = vsel %vm3255_vm0, 1.0, %v3150_v2  ;;  %v1514_v5 = vsel %vm3257_vm11, 1.0, %v3150_v2  ;;  %vm3288_vm0 = vcmp.ne.s32.totalorder %v3228_v16, 4294967295 }
 0x1cd   : > { %v1355_v44 = vsel %vm1097_vm15, %v1513_v54, 0.0  ;;  %v1357_v36 = vsel %vm1097_vm15, %v1514_v5, 0.0  ;;  %vm3289_vm11 = vmmov %vm3288_vm0 }
 0x1ce   : > { %v1354_v58 = vadd.f32 %v1353_v62, %v1352_v41  ;;  %v1642_v62 = vpop.eup %1641  ;;  %v716_v41 = vmul.f32 0.6931472, %v1638_v39 }
 0x1d0   : > { %v1356_v0 = vadd.f32 %v1355_v44, %v1354_v58  ;;  %v718_v58 = vmul.f32 0.6931472, %v1642_v62  ;;  %v3260_v44 = vld [vmem:[#allocation46_spill] sm:$0xff]  ;;  %v778_v59 = vadd.f32 %v716_v41, %v3262_v56  ;;  %v3266_v41 = vld [vmem:[#allocation9_spill] sm:$0xff] }
 0x1d1   : > { %v631_v28 = vpop.xlane.xlu1 %630  ;;  %vm3261_vm10 = vcmp.ne.s32.totalorder %v3260_v44, 4294967295  ;;  %v777_v44 = vadd.f32 %v714_v14, %v3265_v21 }
 0x1d2   : > { %1647 = vlog2.f32 %v631_v28  ;;  %v1358_v28 = vadd.f32 %v1357_v36, %v1356_v0  ;;  %v1516_v5 = vsel %vm3261_vm10, 1.0, %v3150_v2  ;;  %v779_v43 = vadd.f32 %v718_v58, %v3266_v41  ;;  %vm3291_vm10 = vmmov %vm3290_vm9 }
 0x1d3   : > { %1649 = vlog2.f32 %v637_v37  ;;  %v1644_v37 = vpop.eup %1643  ;;  %v1361_v4 = vsel %vm1097_vm15, %v1516_v5, 0.0  ;;  %v3267_v58 = vmov 0.0  }
 0x1d4   : > { %1651 = vlog2.f32 %v640_v40  ;;  %v1646_v39 = vpop.eup %1645  ;;  %v3263_v40 = vld [vmem:[#allocation30_spill] sm:$0xff]  ;;  %v1360_v62 = vadd.f32 %v1359_v3, %v1358_v28  ;;  %v720_v56 = vmul.f32 0.6931472, %v1644_v37  ;;  %v3268_v37 = vld [vmem:[#allocation48_spill] sm:$0xff] }
 0x1d5   : > { %vm3264_vm12 = vcmp.ne.s32.totalorder %v3263_v40, 4294967295  ;;  %v724_v7 = vmul.f32 0.6931472, %v1646_v39  ;;  %vm3269_vm13 = vcmp.ne.s32.totalorder %v3268_v37, 4294967295 }
 0x1d6   : > { %v1517_v0 = vsel %vm3264_vm12, 1.0, %v3150_v2  ;;  %vm3292_vm12 = vcmp.ne.s32.totalorder %v3232_v46, 4294967295 }
 0x1d7   : > { %v2683_v2 = vsel %vm1097_vm15, %v1517_v0, 0.0 }
 0x1dc   : > { %v1648_v22 = vpop.eup %1647 }
 0x1dd   : > { %v1650_v20 = vpop.eup %1649  ;;  %v722_v3 = vmul.f32 0.6931472, %v1648_v22 }
 0x1de   : > { %v726_v5 = vmul.f32 0.6931472, %v1650_v20  ;;  %v1652_v22 = vpop.eup %1651 }
 0x1df   : > { %v728_v35 = vmul.f32 0.6931472, %v1652_v22 }
 0x1e1   : > { %v2621_v57 = vpop.xlane.xlu0 %842 }
 0x1e2   : > { %v1001_v45 = vsub.f32 1.0, %v2621_v57  ;;  %v937_v60 = vsub.f32 %v777_v44, %v2621_v57  ;;  %v2696_v44 = vsel %vm3269_vm13, 1.0, %v3267_v58  ;;  %vm3293_vm13 = vmmov %vm3292_vm12 }
 0x1e4   : > { %v1033_v10 = vmul.f32 %v1001_v45, %v1001_v45  ;;  %v1362_v45 = vadd.f32 %v1361_v4, %v1360_v62  ;;  %v969_v0 = vsel %vm230_vm1, %v937_v60, 0.0 }
 0x1e5   : > { %v2627_v25 = vpop.xlane.xlu1 %845  ;;  %v643_v53 = vpop.xlane.xlu0 %642 }
 0x1e6   : > { %v1002_v49 = vsub.f32 1.0, %v2627_v25  ;;  %v938_v24 = vsub.f32 %v778_v59, %v2627_v25  ;;  %1653 = vlog2.f32 %v643_v53  ;;  %v2757_v42 = vadd.f32 %v2683_v2, %v1362_v45 }
 0x1e8   : > { %v1034_v14 = vmul.f32 %v1002_v49, %v1002_v49  ;;  %v970_v25 = vsel %vm231_vm2, %v938_v24, 0.0  ;;  %v3270_v49 = vld [vmem:[#allocation31_spill] sm:$0xff]  ;;  %v1065_v24 = vsel %vm230_vm1, %v1033_v10, 0.0  ;;  %v1098_v10 = vsel %vm1097_vm15, %v969_v0, 0.0 }
 0x1e9   : > { %v2635_v13 = vpop.xlane.xlu1 %848  ;;  %v646_v50 = vpop.xlane.xlu0 %645  ;;  %v780_v39 = vadd.f32 %v720_v56, %v3270_v49  ;;  %v1099_v62 = vsel %vm1097_vm15, %v970_v25, 0.0  ;;  %vm3278_vm1 = vcmp.ne.s32.totalorder %v3223_v47, 4294967295 }
 0x1ea   : > { %v1003_v17 = vsub.f32 1.0, %v2635_v13  ;;  %v939_v53 = vsub.f32 %v779_v43, %v2635_v13  ;;  %1655 = vlog2.f32 %v646_v50  ;;  %v3271_v13 = vld [vmem:[#allocation34_spill] sm:$0xff]  ;;  %v1066_v4 = vsel %vm231_vm2, %v1034_v14, 0.0  ;;  %vm3279_vm2 = vmmov %vm3278_vm1 }
 0x1eb   : > { %v782_v50 = vadd.f32 %v724_v7, %v3271_v13  ;;  %v3272_v7 = vld [vmem:[#allocation33_spill] sm:$0xff]  ;;  %v1170_v14 = vsel %vm1097_vm15, %v1065_v24, 0.0  ;;  %v1100_v49 = vadd.f32 %v1099_v62, %v1098_v10 }
 0x1ec   : > { %v1035_v43 = vmul.f32 %v1003_v17, %v1003_v17  ;;  %v971_v34 = vsel %vm232_vm3, %v939_v53, 0.0  ;;  %v781_v17 = vadd.f32 %v722_v3, %v3272_v7 }
 0x1ed   : > { %v2642_v8 = vpop.xlane.xlu1 %851  ;;  %v2644_v63 = vpop.xlane.xlu0 %648 }
 0x1ee   : > { %v1004_v57 = vsub.f32 1.0, %v2642_v8  ;;  %v940_v21 = vsub.f32 %v780_v39, %v2642_v8  ;;  %1657 = vlog2.f32 %v2644_v63  ;;  %v3273_v8 = vld [vmem:[#allocation36_spill] sm:$0xff]  ;;  %v1171_v39 = vsel %vm1097_vm15, %v1066_v4, 0.0 }
 0x1ef   : > { %v783_v25 = vadd.f32 %v726_v5, %v3273_v8  ;;  %v1067_v13 = vsel %vm232_vm3, %v1035_v43, 0.0  ;;  %v1101_v63 = vsel %vm1097_vm15, %v971_v34, 0.0  ;;  %v1172_v43 = vadd.f32 %v1171_v39, %v1170_v14 }
 0x1f0   : > { %v1036_v60 = vmul.f32 %v1004_v57, %v1004_v57  ;;  %v1654_v57 = vpop.eup %1653  ;;  %v972_v3 = vsel %vm233_vm4, %v940_v21, 0.0  ;;  %v1173_v62 = vsel %vm1097_vm15, %v1067_v13, 0.0  ;;  %v3274_v21 = vld [vmem:[#allocation37_spill] sm:$0xff]  ;;  %vm3280_vm3 = vcmp.ne.s32.totalorder %v3224_v19, 4294967295 }
 0x1f1   : > { %v2650_v61 = vpop.xlane.xlu1 %854  ;;  %v2652_v32 = vpop.xlane.xlu0 %651  ;;  %v730_v7 = vmul.f32 0.6931472, %v1654_v57  ;;  %v1103_v10 = vsel %vm1097_vm15, %v972_v3, 0.0  ;;  %v3275_v3 = vld [vmem:[#allocation40_spill] sm:$0xff] }
 0x1f2   : > { %v1005_v20 = vsub.f32 1.0, %v2650_v61  ;;  %v941_v53 = vsub.f32 %v781_v17, %v2650_v61  ;;  %v1068_v4 = vsel %vm233_vm4, %v1036_v60, 0.0  ;;  %1659 = vlog2.f32 %v2652_v32  ;;  %vm3283_vm4 = vmmov %vm3280_vm3 }
 0x1f3   : > { %v1102_v17 = vadd.f32 %v1101_v63, %v1100_v49  ;;  %v1175_v32 = vsel %vm1097_vm15, %v1068_v4, 0.0 }
 0x1f4   : > { %v1037_v22 = vmul.f32 %v1005_v20, %v1005_v20  ;;  %v784_v20 = vadd.f32 %v728_v35, %v3274_v21  ;;  %v1656_v34 = vpop.eup %1655  ;;  %v973_v23 = vsel %vm234_vm5, %v941_v53, 0.0  ;;  %v1174_v35 = vadd.f32 %v1173_v62, %v1172_v43 }
 0x1f5   : > { %v2658_v54 = vpop.xlane.xlu1 %857  ;;  %v2660_v51 = vpop.xlane.xlu0 %654  ;;  %v732_v13 = vmul.f32 0.6931472, %v1656_v34  ;;  %v1105_v53 = vsel %vm1097_vm15, %v973_v23, 0.0 }
 0x1f6   : > { %v1006_v0 = vsub.f32 1.0, %v2658_v54  ;;  %v942_v38 = vsub.f32 %v782_v50, %v2658_v54  ;;  %1661 = vlog2.f32 %v2660_v51  ;;  %v1069_v54 = vsel %vm234_vm5, %v1037_v22, 0.0 }
 0x1f7   : > { %v1176_v57 = vadd.f32 %v1175_v32, %v1174_v35  ;;  %v1177_v63 = vsel %vm1097_vm15, %v1069_v54, 0.0  ;;  %v785_v22 = vadd.f32 %v730_v7, %v3275_v3  ;;  %v3276_v7 = vld [vmem:[#allocation41_spill] sm:$0xff]  ;;  %vm3284_vm5 = vcmp.ne.s32.totalorder %v3225_v31, 4294967295 }
 0x1f8   : > { %v1038_v50 = vmul.f32 %v1006_v0, %v1006_v0  ;;  %v974_v8 = vsel %vm235_vm6, %v942_v38, 0.0 }
 0x1f9   : > { %v2669_v18 = vpop.xlane.xlu1 %860  ;;  %v2671_v36 = vpop.xlane.xlu0 %657  ;;  %v1107_v4 = vsel %vm1097_vm15, %v974_v8, 0.0  ;;  %v1178_v29 = vadd.f32 %v1177_v63, %v1176_v57  ;;  %v3277_v63 = vld [vmem:[#allocation43_spill] sm:$0xff] }
 0x1fa   : > { %v1007_v61 = vsub.f32 1.0, %v2669_v18  ;;  %v943_v60 = vsub.f32 %v783_v25, %v2669_v18  ;;  %1663 = vlog2.f32 %v2671_v36  ;;  %v1658_v18 = vpop.eup %1657  ;;  %v1104_v25 = vadd.f32 %v1103_v10, %v1102_v17 }
 0x1fb   : > { %v1070_v0 = vsel %vm235_vm6, %v1038_v50, 0.0  ;;  %v734_v34 = vmul.f32 0.6931472, %v1658_v18  ;;  %v786_v17 = vadd.f32 %v732_v13, %v3276_v7  ;;  %vm3285_vm6 = vmmov %vm3284_vm5 }
 0x1fc   : > { %v1039_v49 = vmul.f32 %v1007_v61, %v1007_v61  ;;  %v975_v38 = vsel %vm236_vm7, %v943_v60, 0.0  ;;  %v1106_v45 = vadd.f32 %v1105_v53, %v1104_v25  ;;  %v1660_v10 = vpop.eup %1659 }
 0x1fd   : > { %v2685_v28 = vpop.xlane.xlu1 %863  ;;  %v2687_v59 = vpop.xlane.xlu0 %660  ;;  %v736_v13 = vmul.f32 0.6931472, %v1660_v10  ;;  %v787_v33 = vadd.f32 %v734_v34, %v3277_v63  ;;  %v3282_v10 = vld [vmem:[#allocation47_spill] sm:$0xff] }
 0x1fe   : > { %v1008_v39 = vsub.f32 1.0, %v2685_v28  ;;  %v944_v36 = vsub.f32 %v784_v20, %v2685_v28  ;;  %v1071_v43 = vsel %vm236_vm7, %v1039_v49, 0.0  ;;  %1665 = vlog2.f32 %v2687_v59 }
 0x1ff   : > { %v1108_v23 = vadd.f32 %v1107_v4, %v1106_v45  ;;  %v1179_v28 = vsel %vm1097_vm15, %v1070_v0, 0.0  ;;  %v1109_v20 = vsel %vm1097_vm15, %v975_v38, 0.0  ;;  %v1181_v1 = vsel %vm1097_vm15, %v1071_v43, 0.0 }
 0x200   : > { %v1040_v62 = vmul.f32 %v1008_v39, %v1008_v39  ;;  %v1662_v32 = vpop.eup %1661  ;;  %v976_v54 = vsel %vm237_vm8, %v944_v36, 0.0  ;;  %v1180_v53 = vadd.f32 %v1179_v28, %v1178_v29  ;;  %vm3286_vm7 = vcmp.ne.s32.totalorder %v3226_v52, 4294967295 }
 0x201   : > { %v2709_v56 = vpop.xlane.xlu1 %866  ;;  %v2711_v41 = vpop.xlane.xlu0 %663  ;;  %v738_v18 = vmul.f32 0.6931472, %v1662_v32  ;;  %v1110_v25 = vadd.f32 %v1109_v20, %v1108_v23  ;;  %v1111_v57 = vsel %vm1097_vm15, %v976_v54, 0.0 }
 0x202   : > { %v1009_v21 = vsub.f32 1.0, %v2709_v56  ;;  %1667 = vlog2.f32 %v2711_v41  ;;  %v945_v50 = vsub.f32 %v785_v22, %v2709_v56  ;;  %v1072_v8 = vsel %vm237_vm8, %v1040_v62, 0.0  ;;  %vm3287_vm8 = vmmov %vm3286_vm7 }
 0x203   : > { %v2791_v56 = vsel %vm1097_vm15, %v2696_v44, 0.0  ;;  %v1182_v22 = vadd.f32 %v1181_v1, %v1180_v53  ;;  %v1112_v62 = vadd.f32 %v1111_v57, %v1110_v25  ;;  %v789_v47 = vadd.f32 %v738_v18, %v3282_v10 }
 0x204   : > { %v1041_v49 = vmul.f32 %v1009_v21, %v1009_v21  ;;  %v1664_v3 = vpop.eup %1663  ;;  %v977_v0 = vsel %vm3278_vm1, %v945_v50, 0.0  ;;  %v3281_v21 = vld [vmem:[#allocation44_spill] sm:$0xff]  ;;  %vm3294_vm1 = vcmp.ne.s32.totalorder %v3234_v48, 4294967295 }
 0x205   : > { %v2728_v24 = vpop.xlane.xlu1 %869  ;;  %v2730_v5 = vpop.xlane.xlu0 %666  ;;  %v788_v34 = vadd.f32 %v736_v13, %v3281_v21  ;;  %v740_v7 = vmul.f32 0.6931472, %v1664_v3 }
 0x206   : > { %v1010_v59 = vsub.f32 1.0, %v2728_v24  ;;  %v946_v39 = vsub.f32 %v786_v17, %v2728_v24  ;;  %1669 = vlog2.f32 %v2730_v5  ;;  %v1183_v24 = vsel %vm1097_vm15, %v1072_v8, 0.0 }
 0x207   : > { %v1073_v44 = vsel %vm3279_vm2, %v1041_v49, 0.0  ;;  %v1113_v17 = vsel %vm1097_vm15, %v977_v0, 0.0  ;;  %v1184_v28 = vadd.f32 %v1183_v24, %v1182_v22  ;;  %v790_v25 = vadd.f32 %v740_v7, %v2266_v55  ;;  %vm3295_vm2 = vmmov %vm3294_vm1 }
 0x208   : > { %v1042_v4 = vmul.f32 %v1010_v59, %v1010_v59  ;;  %v978_v36 = vsel %vm3280_vm3, %v946_v39, 0.0  ;;  %v1666_v23 = vpop.eup %1665  ;;  %v1185_v20 = vsel %vm1097_vm15, %v1073_v44, 0.0  ;;  %v1114_v49 = vadd.f32 %v1113_v17, %v1112_v62 }
 0x209   : > { %v2747_v14 = vpop.xlane.xlu1 %872  ;;  %v2749_v51 = vpop.xlane.xlu0 %669  ;;  %v1115_v32 = vsel %vm1097_vm15, %v978_v36, 0.0  ;;  %v742_v13 = vmul.f32 0.6931472, %v1666_v23  ;;  %v1186_v53 = vadd.f32 %v1185_v20, %v1184_v28  ;;  %vm3296_vm3 = vcmp.ne.s32.totalorder %v3236_v12, 4294967295 }
 0x20a   : > { %v1011_v41 = vsub.f32 1.0, %v2747_v14  ;;  %v947_v45 = vsub.f32 %v787_v33, %v2747_v14  ;;  %1671 = vlog2.f32 %v2749_v51  ;;  %v1074_v14 = vsel %vm3283_vm4, %v1042_v4, 0.0  ;;  %vm3297_vm4 = vmmov %vm3296_vm3 }
 0x20b   : > { %v1187_v18 = vsel %vm1097_vm15, %v1074_v14, 0.0  ;;  %v1116_v31 = vadd.f32 %v1115_v32, %v1114_v49 }
 0x20c   : > { %v1043_v43 = vmul.f32 %v1011_v41, %v1011_v41  ;;  %v1668_v54 = vpop.eup %1667  ;;  %v979_v50 = vsel %vm3284_vm5, %v947_v45, 0.0  ;;  %v1188_v4 = vadd.f32 %v1187_v18, %v1186_v53 }
 0x20d   : > { %v2767_v61 = vpop.xlane.xlu1 %875  ;;  %v673_v2 = vpop.xlane.xlu0 %672  ;;  %v744_v63 = vmul.f32 0.6931472, %v1668_v54  ;;  %v1117_v33 = vsel %vm1097_vm15, %v979_v50, 0.0 }
 0x20e   : > { %v1012_v29 = vsub.f32 1.0, %v2767_v61  ;;  %1673 = vlog2.f32 %v673_v2  ;;  %v1075_v2 = vsel %vm3285_vm6, %v1043_v43, 0.0  ;;  %v948_v59 = vsub.f32 %v788_v34, %v2767_v61 }
 0x20f   : > { %v1189_v61 = vsel %vm1097_vm15, %v1075_v2, 0.0  ;;  %v791_v43 = vadd.f32 %v742_v13, %v2279_v11  ;;  %v1118_v34 = vadd.f32 %v1117_v33, %v1116_v31 }
 0x210   : > { %v1044_v39 = vmul.f32 %v1012_v29, %v1012_v29  ;;  %v1670_v57 = vpop.eup %1669  ;;  %v1190_v29 = vadd.f32 %v1189_v61, %v1188_v4 }
 0x211   : > { %v2782_v60 = vpop.xlane.xlu1 %878  ;;  %v676_v35 = vpop.xlane.xlu0 %675  ;;  %v746_v45 = vmul.f32 0.6931472, %v1670_v57 }
 0x212   : > { %v1013_v8 = vsub.f32 1.0, %v2782_v60  ;;  %v949_v19 = vsub.f32 %v789_v47, %v2782_v60  ;;  %v980_v60 = vsel %vm3286_vm7, %v948_v59, 0.0  ;;  %1675 = vlog2.f32 %v676_v35 }
 0x213   : > { %v1076_v55 = vsel %vm3287_vm8, %v1044_v39, 0.0  ;;  %v1119_v35 = vsel %vm1097_vm15, %v980_v60, 0.0  ;;  %v793_v54 = vadd.f32 %v746_v45, %v2291_v27 }
 0x214   : > { %v1045_v24 = vmul.f32 %v1013_v8, %v1013_v8  ;;  %v981_v44 = vsel %vm3288_vm0, %v949_v19, 0.0  ;;  %v1672_v21 = vpop.eup %1671  ;;  %v1191_v10 = vsel %vm1097_vm15, %v1076_v55, 0.0  ;;  %v1120_v14 = vadd.f32 %v1119_v35, %v1118_v34 }
 0x215   : > { %v2798_v38 = vpop.xlane.xlu1 %881  ;;  %v679_v5 = vpop.xlane.xlu0 %678  ;;  %v748_v20 = vmul.f32 0.6931472, %v1672_v21  ;;  %v1192_v39 = vadd.f32 %v1191_v10, %v1190_v29 }
 0x216   : > { %v1014_v41 = vsub.f32 1.0, %v2798_v38  ;;  %v950_v0 = vsub.f32 %v790_v25, %v2798_v38  ;;  %1677 = vlog2.f32 %v679_v5  ;;  %v792_v38 = vadd.f32 %v744_v63, %v2281_v26 }
 0x217   : > { %v1077_v47 = vsel %vm3289_vm11, %v1045_v24, 0.0  ;;  %v1121_v5 = vsel %vm1097_vm15, %v981_v44, 0.0  ;;  %v794_v25 = vadd.f32 %v748_v20, %v2293_v6 }
 0x218   : > { %v1046_v36 = vmul.f32 %v1014_v41, %v1014_v41  ;;  %v1674_v17 = vpop.eup %1673  ;;  %v982_v11 = vsel %vm3290_vm9, %v950_v0, 0.0  ;;  %v1193_v16 = vsel %vm1097_vm15, %v1077_v47, 0.0  ;;  %v1122_v19 = vadd.f32 %v1121_v5, %v1120_v14 }
 0x219   : > { %v2814_v51 = vpop.xlane.xlu1 %884  ;;  %v682_v1 = vpop.xlane.xlu0 %681  ;;  %v750_v50 = vmul.f32 0.6931472, %v1674_v17  ;;  %v1123_v9 = vsel %vm1097_vm15, %v982_v11, 0.0  ;;  %v1194_v53 = vadd.f32 %v1193_v16, %v1192_v39 }
 0x21a   : > { %v1015_v62 = vsub.f32 1.0, %v2814_v51  ;;  %v1078_v23 = vsel %vm3291_vm10, %v1046_v36, 0.0  ;;  %v951_v28 = vsub.f32 %v791_v43, %v2814_v51  ;;  %1679 = vlog2.f32 %v682_v1 }
 0x21b   : > { %v1195_v51 = vsel %vm1097_vm15, %v1078_v23, 0.0  ;;  %v1124_v63 = vadd.f32 %v1123_v9, %v1122_v19 }
 0x21c   : > { %v1047_v32 = vmul.f32 %v1015_v62, %v1015_v62  ;;  %v983_v1 = vsel %vm3292_vm12, %v951_v28, 0.0  ;;  %v1676_v27 = vpop.eup %1675  ;;  %v3298_v28 = vld [vmem:[#allocation27_spill] sm:$0xff] }
 0x21d   : > { %v888_v3 = vpop.xlane.xlu1 %887  ;;  %v685_v22 = vpop.xlane.xlu0 %684  ;;  %v1125_v0 = vsel %vm1097_vm15, %v983_v1, 0.0  ;;  %v752_v46 = vmul.f32 0.6931472, %v1676_v27  ;;  %vm3299_vm5 = vcmp.ne.s32.totalorder %v3298_v28, 4294967295  ;;  %v3316_v28 = vld [vmem:[#allocation52_spill] sm:$0xff] }
 0x21e   : > { %v1016_v26 = vsub.f32 1.0, %v888_v3  ;;  %v952_v2 = vsub.f32 %v792_v38, %v888_v3  ;;  %1681 = vlog2.f32 %v685_v22  ;;  %v1079_v18 = vsel %vm3293_vm13, %v1047_v32, 0.0  ;;  %vm3300_vm6 = vmmov %vm3299_vm5 }
 0x21f   : > { %v795_v3 = vadd.f32 %v750_v50, %v2302_v30  ;;  %v1196_v22 = vadd.f32 %v1195_v51, %v1194_v53  ;;  %v1197_v55 = vsel %vm1097_vm15, %v1079_v18, 0.0  ;;  %v1126_v21 = vadd.f32 %v1125_v0, %v1124_v63  ;;  %v3303_v53 = vld [vmem:[#allocation50_spill] sm:$0xff]  ;;  %v3306_v0 = vld [vmem:[#allocation24_spill] sm:$0xff] }
 0x220   : > { %v1048_v41 = vmul.f32 %v1016_v26, %v1016_v26  ;;  %v984_v31 = vsel %vm3294_vm1, %v952_v2, 0.0  ;;  %v1678_v24 = vpop.eup %1677  ;;  %v796_v47 = vadd.f32 %v752_v46, %v2300_v15  ;;  %v3302_v2 = vld [vmem:[#allocation51_spill] sm:$0xff]  ;;  %vm3307_vm7 = vcmp.ne.s32.totalorder %v3306_v0, 4294967295 }
 0x221   : > { %v891_v7 = vpop.xlane.xlu1 %890  ;;  %v688_v52 = vpop.xlane.xlu0 %687  ;;  %v1127_v36 = vsel %vm1097_vm15, %v984_v31, 0.0  ;;  %v754_v62 = vmul.f32 0.6931472, %v1678_v24  ;;  %vm3308_vm8 = vmmov %vm3307_vm7 }
 0x222   : > { %v1017_v59 = vsub.f32 1.0, %v891_v7  ;;  %v953_v13 = vsub.f32 %v793_v54, %v891_v7  ;;  %1683 = vlog2.f32 %v688_v52  ;;  %v1080_v6 = vsel %vm3295_vm2, %v1048_v41, 0.0 }
 0x223   : > { %v1198_v7 = vadd.f32 %v1197_v55, %v1196_v22  ;;  %v1199_v48 = vsel %vm1097_vm15, %v1080_v6, 0.0  ;;  %v1128_v10 = vadd.f32 %v1127_v36, %v1126_v21 }
 0x224   : > { %v1049_v33 = vmul.f32 %v1017_v59, %v1017_v59  ;;  %v985_v44 = vsel %vm3296_vm3, %v953_v13, 0.0  ;;  %v1680_v43 = vpop.eup %1679  ;;  %v797_v59 = vadd.f32 %v754_v62, %v3302_v2  ;;  %v3317_v2 = vld [vmem:[#allocation38_spill] sm:$0xff] }
 0x225   : > { %v894_v8 = vpop.xlane.xlu1 %893  ;;  %v691_v49 = vpop.xlane.xlu0 %690  ;;  %v1129_v52 = vsel %vm1097_vm15, %v985_v44, 0.0  ;;  %v756_v11 = vmul.f32 0.6931472, %v1680_v43  ;;  %v1200_v14 = vadd.f32 %v1199_v48, %v1198_v7  ;;  %vm3318_vm12 = vcmp.ne.s32.totalorder %v3317_v2, 4294967295 }
 0x226   : > { %v1018_v57 = vsub.f32 1.0, %v894_v8  ;;  %v954_v45 = vsub.f32 %v794_v25, %v894_v8  ;;  %1685 = vlog2.f32 %v691_v49  ;;  %v1081_v34 = vsel %vm3297_vm4, %v1049_v33, 0.0  ;;  %vm3320_vm13 = vmmov %vm3318_vm12 }
 0x227   : > { %v1201_v23 = vsel %vm1097_vm15, %v1081_v34, 0.0  ;;  %v1130_v32 = vadd.f32 %v1129_v52, %v1128_v10  ;;  %v798_v18 = vadd.f32 %v756_v11, %v3303_v53 }
 0x228   : > { %v1050_v30 = vmul.f32 %v1018_v57, %v1018_v57  ;;  %v986_v12 = vsel %vm3299_vm5, %v954_v45, 0.0  ;;  %v1682_v20 = vpop.eup %1681  ;;  %v1202_v19 = vadd.f32 %v1201_v23, %v1200_v14 }
 0x229   : > { %v897_v61 = vpop.xlane.xlu1 %896  ;;  %v694_v60 = vpop.xlane.xlu0 %693  ;;  %v1131_v9 = vsel %vm1097_vm15, %v986_v12, 0.0  ;;  %v758_v13 = vmul.f32 0.6931472, %v1682_v20 }
 0x22a   : > { %v1019_v4 = vsub.f32 1.0, %v897_v61  ;;  %v955_v29 = vsub.f32 %v795_v3, %v897_v61  ;;  %1687 = vlog2.f32 %v694_v60  ;;  %v1082_v26 = vsel %vm3300_vm6, %v1050_v30, 0.0  ;;  %v3304_v61 = vld [vmem:[#allocation49_spill] sm:$0xff]  ;;  %v3309_v30 = vld [vmem:[#allocation32_spill] sm:$0xff] }
 0x22b   : > { %v1203_v51 = vsel %vm1097_vm15, %v1082_v26, 0.0  ;;  %v1132_v24 = vadd.f32 %v1131_v9, %v1130_v32  ;;  %vm3310_vm0 = vcmp.ne.s32.totalorder %v3309_v30, 4294967295 }
 0x22c   : > { %v1051_v17 = vmul.f32 %v1019_v4, %v1019_v4  ;;  %v987_v50 = vsel %vm248_vm14, %v955_v29, 0.0  ;;  %v1684_v41 = vpop.eup %1683  ;;  %v1204_v22 = vadd.f32 %v1203_v51, %v1202_v19  ;;  %vm3312_vm11 = vmmov %vm3310_vm0 }
 0x22d   : > { %v900_v35 = vpop.xlane.xlu1 %899  ;;  %v697_v38 = vpop.xlane.xlu0 %696  ;;  %v1133_v25 = vsel %vm1097_vm15, %v987_v50, 0.0  ;;  %v760_v55 = vmul.f32 0.6931472, %v1684_v41 }
 0x22e   : > { %v1020_v5 = vsub.f32 1.0, %v900_v35  ;;  %v1083_v8 = vsel %vm248_vm14, %v1051_v17, 0.0  ;;  %v956_v49 = vsub.f32 %v796_v47, %v900_v35  ;;  %1689 = vlog2.f32 %v697_v38  ;;  %v3313_v17 = vld [vmem:[#allocation35_spill] sm:$0xff] }
 0x22f   : > { %v1205_v57 = vsel %vm1097_vm15, %v1083_v8, 0.0  ;;  %vm3305_vm14 = vcmp.ne.s32.totalorder %v3304_v61, 4294967295  ;;  %v1134_v36 = vadd.f32 %v1133_v25, %v1132_v24  ;;  %vm3314_vm9 = vcmp.ne.s32.totalorder %v3313_v17, 4294967295 }
 0x230   : > { %v1052_v1 = vmul.f32 %v1020_v5, %v1020_v5  ;;  %v2890_v3 = vsel %vm3305_vm14, 1.0, %v3267_v58  ;;  %v1686_v60 = vpop.eup %1685  ;;  %v988_v4 = vsel %vm3307_vm7, %v956_v49, 0.0  ;;  %v1206_v45 = vadd.f32 %v1205_v57, %v1204_v22  ;;  %v3311_v58 = vld [vmem:[#allocation53_spill] sm:$0xff]  ;;  %vm3315_vm10 = vmmov %vm3314_vm9  ;;  %v3319_v49 = vld [vmem:[#allocation55_spill] sm:$0xff] }
 0x231   : > { %v903_v16 = vpop.xlane.xlu1 %902  ;;  %v700_v15 = vpop.xlane.xlu0 %699  ;;  %v799_v62 = vadd.f32 %v758_v13, %v3311_v58  ;;  %v762_v34 = vmul.f32 0.6931472, %v1686_v60  ;;  %v1135_v29 = vsel %vm1097_vm15, %v988_v4, 0.0  ;;  %v800_v12 = vadd.f32 %v760_v55, %v3316_v28  ;;  %v3321_v57 = vld [vmem:[#allocation39_spill] sm:$0xff]  ;;  %v3325_v58 = vld [vmem:[#allocation57_spill] sm:$0xff] }
 0x232   : > { %v1021_v39 = vsub.f32 1.0, %v903_v16  ;;  %v957_v27 = vsub.f32 %v797_v59, %v903_v16  ;;  %1691 = vlog2.f32 %v700_v15  ;;  %v1084_v6 = vsel %vm3308_vm8, %v1052_v1, 0.0 }
 0x233   : > { %v1207_v52 = vsel %vm1097_vm15, %v1084_v6, 0.0  ;;  %v1136_v14 = vadd.f32 %v1135_v29, %v1134_v36  ;;  %vm3322_vm1 = vcmp.ne.s32.totalorder %v3321_v57, 4294967295  ;;  %v3326_v29 = vld [vmem:[#allocation42_spill] sm:$0xff] }
 0x234   : > { %v1053_v63 = vmul.f32 %v1021_v39, %v1021_v39  ;;  %v989_v43 = vsel %vm3310_vm0, %v957_v27, 0.0  ;;  %v1688_v21 = vpop.eup %1687  ;;  %v1208_v50 = vadd.f32 %v1207_v52, %v1206_v45  ;;  %v801_v39 = vadd.f32 %v762_v34, %v3319_v49  ;;  %vm3324_vm2 = vmmov %vm3322_vm1 }
 0x235   : > { %v906_v31 = vpop.xlane.xlu1 %905  ;;  %v703_v33 = vpop.xlane.xlu0 %702  ;;  %v1137_v11 = vsel %vm1097_vm15, %v989_v43, 0.0  ;;  %v764_v20 = vmul.f32 0.6931472, %v1688_v21  ;;  %vm3327_vm3 = vcmp.ne.s32.totalorder %v3326_v29, 4294967295 }
 0x236   : > { %v958_v46 = vsub.f32 %v798_v18, %v906_v31  ;;  %v1022_v44 = vsub.f32 1.0, %v906_v31  ;;  %1693 = vlog2.f32 %v703_v33  ;;  %v1085_v35 = vsel %vm3312_vm11, %v1053_v63, 0.0  ;;  %v3323_v31 = vld [vmem:[#allocation54_spill] sm:$0xff]  ;;  %vm3330_vm4 = vmmov %vm3327_vm3 }
 0x237   : > { %v1209_v32 = vsel %vm1097_vm15, %v1085_v35, 0.0  ;;  %v1138_v9 = vadd.f32 %v1137_v11, %v1136_v14  ;;  %v802_v33 = vadd.f32 %v764_v20, %v3323_v31  ;;  %v3329_v11 = vld [vmem:[#allocation59_spill] sm:$0xff] }
 0x238   : > { %v1054_v38 = vmul.f32 %v1022_v44, %v1022_v44  ;;  %v990_v10 = vsel %vm3314_vm9, %v958_v46, 0.0  ;;  %v1690_v26 = vpop.eup %1689  ;;  %v1210_v27 = vadd.f32 %v1209_v32, %v1208_v50  ;;  %vm3344_vm9 = vcmp.ne.s32.totalorder %v3263_v40, 4294967295 }
 0x239   : > { %v909_v7 = vpop.xlane.xlu1 %908  ;;  %v706_v48 = vpop.xlane.xlu0 %705  ;;  %v1139_v16 = vsel %vm1097_vm15, %v990_v10, 0.0  ;;  %v766_v13 = vmul.f32 0.6931472, %v1690_v26 }
 0x23a   : > { %v959_v47 = vsub.f32 %v799_v62, %v909_v7  ;;  %v1023_v5 = vsub.f32 1.0, %v909_v7  ;;  %v1086_v23 = vsel %vm3315_vm10, %v1054_v38, 0.0  ;;  %1695 = vlog2.f32 %v706_v48 }
 0x23b   : > { %v1211_v51 = vsel %vm1097_vm15, %v1086_v23, 0.0  ;;  %v1140_v18 = vadd.f32 %v1139_v16, %v1138_v9  ;;  %v803_v62 = vadd.f32 %v766_v13, %v3325_v58 }
 0x23c   : > { %v1055_v54 = vmul.f32 %v1023_v5, %v1023_v5  ;;  %v991_v59 = vsel %vm3318_vm12, %v959_v47, 0.0  ;;  %v1692_v19 = vpop.eup %1691  ;;  %v1212_v22 = vadd.f32 %v1211_v51, %v1210_v27  ;;  %v3328_v47 = vld [vmem:[#allocation56_spill] sm:$0xff]  ;;  %v3334_v51 = vld [vmem:[#allocation45_spill] sm:$0xff]  ;;  %vm3347_vm12 = vmmov %vm3344_vm9 }
 0x23d   : > { %v912_v15 = vpop.xlane.xlu1 %911  ;;  %v709_v8 = vpop.xlane.xlu0 %708  ;;  %v1141_v25 = vsel %vm1097_vm15, %v991_v59, 0.0  ;;  %v768_v24 = vmul.f32 0.6931472, %v1692_v19  ;;  %v3331_v59 = vld [vmem:[#allocation26_spill] sm:$0xff]  ;;  %vm3335_vm6 = vcmp.ne.s32.totalorder %v3334_v51, 4294967295 }
 0x23e   : > { %v1087_v1 = vsel %vm3320_vm13, %v1055_v54, 0.0  ;;  %v960_v41 = vsub.f32 %v800_v12, %v912_v15  ;;  %v1024_v53 = vsub.f32 1.0, %v912_v15  ;;  %1697 = vlog2.f32 %v709_v8  ;;  %v3333_v8 = vld [vmem:[#allocation58_spill] sm:$0xff]  ;;  %vm3337_vm7 = vmmov %vm3335_vm6 }
 0x23f   : > { %v1213_v0 = vsel %vm1097_vm15, %v1087_v1, 0.0  ;;  %v1142_v30 = vadd.f32 %v1141_v25, %v1140_v18  ;;  %v804_v5 = vadd.f32 %v768_v24, %v3328_v47  ;;  %vm3332_vm5 = vcmp.ne.s32.totalorder %v3331_v59, 4294967295  ;;  %v3343_v47 = vld [vmem:[#allocation61_spill] sm:$0xff] }
 0x240   : > { %v992_v63 = vsel %vm3322_vm1, %v960_v41, 0.0  ;;  %v1694_v60 = vpop.eup %1693  ;;  %v1056_v4 = vmul.f32 %v1024_v53, %v1024_v53  ;;  %v1214_v21 = vadd.f32 %v1213_v0, %v1212_v22  ;;  %vm3336_vm14 = vmmov %vm3332_vm5  ;;  %vm3348_vm13 = vcmp.ne.s32.totalorder %v3268_v37, 4294967295 }
 0x241   : > { %v915_v46 = vpop.xlane.xlu1 %914  ;;  %v712_v55 = vpop.xlane.xlu0 %711  ;;  %v770_v6 = vmul.f32 0.6931472, %v1694_v60  ;;  %v1143_v44 = vsel %vm1097_vm15, %v992_v63, 0.0  ;;  %vm3349_vm1 = vmmov %vm3348_vm13  ;;  %v1367_v37 = vsel %vm1097_vm15, %v2890_v3, 0.0 }
 0x242   : > { %v961_v36 = vsub.f32 %v801_v39, %v915_v46  ;;  %v1025_v45 = vsub.f32 1.0, %v915_v46  ;;  %v1088_v43 = vsel %vm3324_vm2, %v1056_v4, 0.0  ;;  %1699 = vlog2.f32 %v712_v55  ;;  %v3338_v4 = vld [vmem:[#allocation28_spill] sm:$0xff] }
 0x243   : > { %v1215_v34 = vsel %vm1097_vm15, %v1088_v43, 0.0  ;;  %v1144_v48 = vadd.f32 %v1143_v44, %v1142_v30  ;;  %v805_v23 = vadd.f32 %v770_v6, %v3329_v11  ;;  %vm3339_vm8 = vcmp.ne.s32.totalorder %v3338_v4, 4294967295 }
 0x244   : > { %v993_v35 = vsel %vm3327_vm3, %v961_v36, 0.0  ;;  %v1057_v38 = vmul.f32 %v1025_v45, %v1025_v45  ;;  %v1696_v7 = vpop.eup %1695  ;;  %v1216_v12 = vadd.f32 %v1215_v34, %v1214_v21  ;;  %v3340_v45 = vld [vmem:[#allocation46_spill] sm:$0xff]  ;;  %vm3342_vm11 = vmmov %vm3339_vm8  ;;  %vm3350_vm2 = vcmp.ne.s32.totalorder %v3304_v61, 4294967295 }
 0x245   : > { %v1145_v52 = vsel %vm1097_vm15, %v993_v35, 0.0  ;;  %v918_v17 = vpop.xlane.xlu1 %917  ;;  %v921_v10 = vpop.xlane.xlu0 %920  ;;  %v772_v28 = vmul.f32 0.6931472, %v1696_v7  ;;  %vm3341_vm0 = vcmp.ne.s32.totalorder %v3340_v45, 4294967295  ;;  %vm3351_vm3 = vmmov %vm3350_vm2 }
 0x246   : > { %v1089_v26 = vsel %vm3330_vm4, %v1057_v38, 0.0  ;;  %v962_v20 = vsub.f32 %v802_v33, %v918_v17  ;;  %v1026_v32 = vsub.f32 1.0, %v918_v17  ;;  %v963_v54 = vsub.f32 %v803_v62, %v921_v10  ;;  %vm3345_vm10 = vmmov %vm3341_vm0 }
 0x247   : > { %v1217_v14 = vsel %vm1097_vm15, %v1089_v26, 0.0  ;;  %v1027_v50 = vsub.f32 1.0, %v921_v10  ;;  %v1146_v16 = vadd.f32 %v1145_v52, %v1144_v48  ;;  %v806_v49 = vadd.f32 %v772_v28, %v3333_v8 }
 0x248   : > { %v1218_v2 = vadd.f32 %v1217_v14, %v1216_v12  ;;  %v994_v15 = vsel %vm3332_vm5, %v962_v20, 0.0  ;;  %v1698_v39 = vpop.eup %1697  ;;  %v1058_v19 = vmul.f32 %v1026_v32, %v1026_v32  ;;  %v995_v1 = vsel %vm3335_vm6, %v963_v54, 0.0  ;;  %v3346_v54 = vld [vmem:[#allocation60_spill] sm:$0xff] }
 0x249   : > { %v1147_v9 = vsel %vm1097_vm15, %v994_v15, 0.0  ;;  %v1059_v41 = vmul.f32 %v1027_v50, %v1027_v50  ;;  %v924_v13 = vpop.xlane.xlu1 %923  ;;  %v927_v27 = vpop.xlane.xlu0 %926  ;;  %v774_v53 = vmul.f32 0.6931472, %v1698_v39  ;;  %v1149_v25 = vsel %vm1097_vm15, %v995_v1, 0.0 }
 0x24a   : > { %v1148_v18 = vadd.f32 %v1147_v9, %v1146_v16  ;;  %v964_v57 = vsub.f32 %v804_v5, %v924_v13  ;;  %v1090_v63 = vsel %vm3336_vm14, %v1058_v19, 0.0  ;;  %v1028_v33 = vsub.f32 1.0, %v924_v13 }
 0x24b   : > { %v1091_v31 = vsel %vm3337_vm7, %v1059_v41, 0.0  ;;  %v965_v60 = vsub.f32 %v805_v23, %v927_v27  ;;  %v1219_v24 = vsel %vm1097_vm15, %v1090_v63, 0.0  ;;  %v1029_v21 = vsub.f32 1.0, %v927_v27 }
 0x24c   : > { %v1150_v22 = vadd.f32 %v1149_v25, %v1148_v18  ;;  %v1221_v0 = vsel %vm1097_vm15, %v1091_v31, 0.0  ;;  %v996_v46 = vsel %vm3339_vm8, %v964_v57, 0.0  ;;  %v1700_v55 = vpop.eup %1699  ;;  %v1220_v6 = vadd.f32 %v1219_v24, %v1218_v2 }
 0x24d   : > { %v1060_v44 = vmul.f32 %v1028_v33, %v1028_v33  ;;  %v1151_v36 = vsel %vm1097_vm15, %v996_v46, 0.0  ;;  %v997_v30 = vsel %vm3341_vm0, %v965_v60, 0.0  ;;  %v930_v43 = vpop.xlane.xlu1 %929  ;;  %v776_v58 = vmul.f32 0.6931472, %v1700_v55  ;;  %v933_v29 = vpop.xlane.xlu0 %932 }
 0x24e   : > { %v1152_v62 = vadd.f32 %v1151_v36, %v1150_v22  ;;  %v1153_v34 = vsel %vm1097_vm15, %v997_v30, 0.0  ;;  %v1222_v35 = vadd.f32 %v1221_v0, %v1220_v6  ;;  %v966_v7 = vsub.f32 %v806_v49, %v930_v43 }
 0x24f   : > { %v1092_v38 = vsel %vm3342_vm11, %v1060_v44, 0.0  ;;  %v1030_v48 = vsub.f32 1.0, %v930_v43  ;;  %v1061_v17 = vmul.f32 %v1029_v21, %v1029_v21  ;;  %v807_v5 = vadd.f32 %v774_v53, %v3343_v47 }
 0x250   : > { %v1223_v52 = vsel %vm1097_vm15, %v1092_v38, 0.0  ;;  %v1154_v10 = vadd.f32 %v1153_v34, %v1152_v62  ;;  %v998_v23 = vsel %vm3344_vm9, %v966_v7, 0.0  ;;  %v1031_v12 = vsub.f32 1.0, %v933_v29 }
 0x251   : > { %v1224_v11 = vadd.f32 %v1223_v52, %v1222_v35  ;;  %v1062_v28 = vmul.f32 %v1030_v48, %v1030_v48  ;;  %v936_v26 = vpop.xlane.xlu1 %935  ;;  %v1093_v20 = vsel %vm3345_vm10, %v1061_v17, 0.0  ;;  %v1155_v14 = vsel %vm1097_vm15, %v998_v23, 0.0  ;;  %v3353_v48 = vld [vmem:[#allocation63_spill] sm:$0xff] }
 0x252   : > { %v967_v32 = vsub.f32 %v807_v5, %v933_v29  ;;  %v808_v50 = vadd.f32 %v776_v58, %v3346_v54  ;;  %v1225_v16 = vsel %vm1097_vm15, %v1093_v20, 0.0  ;;  %v1156_v59 = vadd.f32 %v1155_v14, %v1154_v10 }
 0x253   : > { %v1094_v2 = vsel %vm3347_vm12, %v1062_v28, 0.0  ;;  %v1063_v15 = vmul.f32 %v1031_v12, %v1031_v12  ;;  %v1226_v8 = vadd.f32 %v1225_v16, %v1224_v11  ;;  %v1032_v1 = vsub.f32 1.0, %v936_v26 }
 0x254   : > { %v1227_v49 = vsel %vm1097_vm15, %v1094_v2, 0.0  ;;  %v999_v39 = vsel %vm3348_vm13, %v967_v32, 0.0  ;;  %v968_v19 = vsub.f32 %v808_v50, %v936_v26  ;;  %v1366_v27 = vadd.f32 %v2791_v56, %v2757_v42 }
 0x255   : > { %v1095_v9 = vsel %vm3349_vm1, %v1063_v15, 0.0  ;;  %v1157_v51 = vsel %vm1097_vm15, %v999_v39, 0.0  ;;  %v1228_v41 = vadd.f32 %v1227_v49, %v1226_v8  ;;  %v1064_v18 = vmul.f32 %v1032_v1, %v1032_v1 }
 0x256   : > { %v1158_v13 = vadd.f32 %v1157_v51, %v1156_v59  ;;  %v1000_v40 = vsel %vm3350_vm2, %v968_v19, 0.0  ;;  %v1229_v53 = vsel %vm1097_vm15, %v1095_v9, 0.0  ;;  %v1368_v60 = vadd.f32 %v1367_v37, %v1366_v27 }
 0x257   : > { %v1159_v25 = vsel %vm1097_vm15, %v1000_v40, 0.0  ;;  %v1230_v63 = vadd.f32 %v1229_v53, %v1228_v41  ;;  %v1096_v31 = vsel %vm3351_vm3, %v1064_v18, 0.0  ;;  %v3352_v38 = vlaneseq }
 0x258   : > { %v1160_v57 = vadd.f32 %v1159_v25, %v1158_v13  ;;  %v1231_v33 = vsel %vm1097_vm15, %v1096_v31, 0.0  ;;  %vm1385_vm4 = vcmp.eq.s32.totalorder %v3353_v48, 2  ;;  %vm1383_vm5 = vcmp.eq.s32.totalorder %v3353_v48, 1 }
 0x259   : > { %v1232_v24 = vadd.f32 %v1231_v33, %v1230_v63  ;;  %v1379_v7 = vshrl.u32 %v3352_v38, 7  ;;  %vm1381_vm6 = vcmp.eq.s32.totalorder %v3353_v48, 0 }
 0x25a   : > { %1161 = vadd.xlane.f32.xlu0 %v1160_v57 }
 0x25b   : > { %1233 = vadd.xlane.f32.xlu1 %v1232_v24  ;;  %vm1380_vm15 = vcmp.eq.s32.totalorder %v1379_v7, 0 }
 0x25c   : > { %vm1386_vm14 = vmand %vm1380_vm15, %vm1385_vm4 }
 0x25d   : > { %vm1384_vm7 = vmand %vm1380_vm15, %vm1383_vm5 }
 0x25e   : > { %1369 = vadd.xlane.f32.xlu0 %v1368_v60  ;;  %vm1382_vm8 = vmand %vm1380_vm15, %vm1381_vm6 }
 0x2e7   : > { %v1162_v42 = vpop.xlane.xlu0 %1161 }
 0x2e8   : > { %v1163_v56 = vrot.slane %v1162_v42, 4  ;;  %v1234_v0 = vpop.xlane.xlu1 %1233 }
 0x2e9   : > { %v1235_v4 = vrot.slane %v1234_v0, 4 }
 0x2ea   : > { %v1164_v22 = vadd.f32 %v1163_v56, %v1162_v42 }
 0x2eb   : > { %v1370_v46 = vpop.xlane.xlu0 %1369  ;;  %v1236_v6 = vadd.f32 %v1235_v4, %v1234_v0 }
 0x2ec   : > { %v1165_v55 = vrot.slane %v1164_v22, 2  ;;  %v1371_v3 = vrot.slane %v1370_v46, 4 }
 0x2ed   : > { %v1237_v36 = vrot.slane %v1236_v6, 2 }
 0x2ee   : > { %v1372_v44 = vadd.f32 %v1371_v3, %v1370_v46  ;;  %v1166_v61 = vadd.f32 %v1165_v55, %v1164_v22 }
 0x2ef   : > { %v1238_v43 = vadd.f32 %v1237_v36, %v1236_v6 }
 0x2f0   : > { %v1373_v45 = vrot.slane %v1372_v44, 2  ;;  %v1167_v30 = vrot.slane %v1166_v61, 1 }
 0x2f1   : > { %v1239_v21 = vrot.slane %v1238_v43, 1 }
 0x2f2   : > { %v1374_v58 = vadd.f32 %v1373_v45, %v1372_v44  ;;  %v1168_v62 = vadd.f32 %v1167_v30, %v1166_v61 }
 0x2f3   : > { %v1240_v29 = vadd.f32 %v1239_v21, %v1238_v43 }
 0x2f4   : > { %1524 = vpush %v1168_v62  ;;  %v1375_v34 = vrot.slane %v1374_v58, 1 }
 0x2f5   : > { %1526 = vpush %v1240_v29 }
 0x2f6   : > { %v1376_v35 = vadd.f32 %v1375_v34, %v1374_v58 }
 0x2f8   : > { %1528 = vpush %v1376_v35 }
 0x325   : > { %s1525_s3 = spop %1524 }
 0x326   : > { %s1527_s4 = spop %1526  ;;  %v1391_v47 = vstv %s1525_s3 }
 0x327   : > { %v1389_v17 = vstv %s1527_s4 }
 0x329   : > { %s1529_s6 = spop %1528 }
 0x32a   : > { %v1387_v52 = vstv %s1529_s6 }
 0x32b   : > { %v1388_v10 = vsel %vm1386_vm14, %v1387_v52, 0.0 }
 0x32c   : > { %v1390_v5 = vsel %vm1384_vm7, %v1389_v17, %v1388_v10 }
 0x32d   : > { %v1392_v11 = vsel %vm1382_vm8, %v1391_v47, %v1390_v5 }
 0x32e   : > { %1393 = vst [vmem:[%s153_s7] sm:$0xff] %v1392_v11 }
 0x32f   : > { %1725 = shalt.err (!%p1722_p3)
}
 0x330   : > { %s1726_s25 = scalar_lea.hbm %s2993_s17, 128  ;;  %s1730_s28 = scalar_lea.hbm %s3037_s2, 256 }
 0x331   : > { %p1727_p4 = scmp.ne.s32.totalorder %s2993_s17, %s1726_s25  ;;  %p1731_p9 = scmp.lt.u32.totalorder %s2993_s17, %s3037_s2 }
 0x332   : > { %p1732_p10 = scmp.lt.u32.totalorder %s1730_s28, %s1726_s25  ;;  %p1734_p12 = scmp.lt.u32.totalorder %s1726_s25, %s2993_s17 }
 0x333   : > { %p1728_p7 = pnand %p1727_p4, %p1832_p5 }
 0x334   : > { %p1733_p11 = por %p1732_p10, %p1731_p9 }
 0x335   : > { %p1729_p8 = pneg %p1728_p7 }
 0x336   : > { %p1735_p13 = por %p1734_p12, %p1733_p11 }
 0x338   : > { %p1736_p0 = pnand %p1735_p13, %p1729_p8 }
 0x33a   : > { %1739 = shalt.err (!%p1736_p0)
}
 0x33b   : > { %1530 = dma.vmem_to_hbm [thread:$0]  (%p1832_p5), %s2995_s8, 128, %s2993_s17, %s1395_s13  }
 0x33c PF: > { %p1536_p1 = scmp.ge.s32.totalorder %s1774_s12, 2  ;;  %s1420_s3 = sand.u32 1, %s1762_s9  }
 0x33d   : > { %s1421_s4 = scalar_lea.sflag [#allocation3], %s1420_s3 }
 0x33e   : > { %p1533_p2 = pnand %p1536_p1, %p1836_p6 }
 0x340   : > { %1757 = dma.done.wait (!%p1533_p2), %s1421_s4, 128  }
 0x341   : > { %1759 = vsyncadd (!%p1533_p2), %s1421_s4, 4294967168  ;;  %p12_p3 = scmp.ge.s32.totalorder %s1819_s15, 4   ;;  %s3354_s9 = smov %s1766_s10 }
 0x342   : > { %s3355_s10 = smov %s1770_s11  ;;  %s3356_s11 = smov %s1830_s18 }
 0x343   : > { %s3357_s12 = smov %s1819_s15  ;;  %14 = sbr.rel (!%p12_p3) target bundleno = 3 (0x3), region = 66 }
 0x34a   :  { %1426 = vsyncpa [#allocation3], 1 }
 0x34b   :  { %1428 = vsyncpa [#allocation3 + $0x1], 1 }

</bundles_post_ra>
